<compile_context>
chip_gen: v5e
topology: v5e:2x2
jax: 0.10.0
libtpu: 0.0.40
codegen_flags: <defaults>
</compile_context>

<pallas_src>
import jax
import jax.numpy as jnp
from jax.experimental import pallas as pl
from jax.experimental.pallas import tpu as pltpu

_FEATURE_NAMES = (
    "alpha", "beta", "gamma",
    "dalpha", "dbeta", "dgamma",
    "phi", "theta", "dphi", "dtheta",
)

_STEP_COST_COLS = 4  # fixed per-grid-step overhead ~= 4 columns of HBM traffic


def _cdiv(a, b):
    return -(-a // b)


def _round_up(a, m):
    return _cdiv(a, m) * m


def _choose_lane_tiling(lanes, lane_tile):
    """Pick (tbl, padded_lanes).

    tbl is a multiple of 128, <= lane_tile, chosen to minimise
    (padded 128-lane columns) + _STEP_COST_COLS * (grid steps), which avoids
    the up-to-2x padding blowup of naively rounding lanes up to lane_tile
    while still preferring large tiles (long DMA runs, few grid steps).
    """
    m = lanes // 128
    d_max = max(1, min(m, lane_tile // 128))
    best = None  # (cost, -d, d, m_pad)
    for d in range(1, d_max + 1):
        m_pad = _round_up(m, d)
        cost = m_pad + _STEP_COST_COLS * (m_pad // d)
        key = (cost, -d)
        if best is None or key < best[0]:
            best = (key, d, m_pad)
    _, d, m_pad = best
    return d * 128, m_pad * 128


def _euc_feature_kernel(x_ref, o_ref):
    """x_ref: (10, 8, tbl) packed state features (alpha..dtheta order).
    o_ref: (12, 8, tbl) Euclidean features."""
    n_cols = x_ref.shape[-1] // 128
    od = o_ref.dtype
    f32 = jnp.float32

    # Statically-unrolled loop over 128-lane columns: per-column liveness is
    # ~1 vreg per temporary while the (10/12, 8, tbl) DMA blocks stay large.
    for c in range(n_cols):
        sl = pl.ds(c * 128, 128)

        def load(r, sl=sl):
            return x_ref[r, :, sl].astype(f32)   # (8, 128) = one vreg

        alpha, beta, gamma = load(0), load(1), load(2)
        dalpha, dbeta, dgamma = load(3), load(4), load(5)
        phi, theta = load(6), load(7)
        dphi, dtheta = load(8), load(9)

        ca, sa = jnp.cos(alpha), jnp.sin(alpha)
        cb, sb = jnp.cos(beta), jnp.sin(beta)
        cg, sg = jnp.cos(gamma), jnp.sin(gamma)
        cp, sp = jnp.cos(phi), jnp.sin(phi)
        ct, st = jnp.cos(theta), jnp.sin(theta)

        # hoisted common products
        sb_cg = sb * cg
        cb_cg = cb * cg
        sb_sg = sb * sg

        x_quad = ca * sb_cg + sa * sg
        y_quad = sa * sb_cg - ca * sg
        z_quad = cb_cg

        # d_x_quad/d_alpha == y_quad ; d_y_quad/d_alpha == -x_quad  (reuse)
        v_x_quad = (dalpha * y_quad
                    + dbeta * (-ca * cb_cg)
                    + dgamma * (ca * sb_sg - sa * cg))
        v_y_quad = (-dalpha * x_quad
                    + dbeta * (-sa * cb_cg)
                    + dgamma * (sa * sb_sg + ca * cg))
        v_z_quad = dbeta * sb_cg + dgamma * cb * sg

        st_cp = st * cp
        ct_cp = ct * cp
        x_pend = st_cp
        y_pend = -sp
        z_pend = ct_cp
        v_x_pend = -dtheta * ct_cp + dphi * st * sp
        v_y_pend = dphi * cp
        v_z_pend = dtheta * st_cp + dphi * ct * sp

        # 12 unmasked (8, 128) stores into the lane-dense output block.
        o_ref[0, :, sl] = x_quad.astype(od)
        o_ref[1, :, sl] = y_quad.astype(od)
        o_ref[2, :, sl] = z_quad.astype(od)
        o_ref[3, :, sl] = v_x_quad.astype(od)
        o_ref[4, :, sl] = v_y_quad.astype(od)
        o_ref[5, :, sl] = v_z_quad.astype(od)
        o_ref[6, :, sl] = x_pend.astype(od)
        o_ref[7, :, sl] = y_pend.astype(od)
        o_ref[8, :, sl] = z_pend.astype(od)
        o_ref[9, :, sl] = v_x_pend.astype(od)
        o_ref[10, :, sl] = v_y_pend.astype(od)
        o_ref[11, :, sl] = v_z_pend.astype(od)


def transform_euc_nn_input(x, state_index_dict, *, lane_tile=2048,
                           min_pallas_batch=2048, out_dtype=None,
                           feature_major=False):
    """JAX/Pallas equivalent of PyTorch TransformEucNNInput.forward.

    x: (B, D) state matrix.
    Default: returns (B, 12) (PyTorch contract).
    feature_major=True: returns the packed (12, padded_B) feature-major
      kernel output directly (padded_B >= B; entries beyond B are padding),
      so a downstream consumer contracting the 12-axis can skip the unpack
      transpose pass entirely.
    out_dtype: output dtype (default x.dtype); math is always f32 internally.
    """
    assert x.ndim == 2
    B, _ = x.shape
    out_dtype = x.dtype if out_dtype is None else jnp.dtype(out_dtype)

    if B == 0:
        return jnp.zeros((12, 0) if feature_major else (0, 12), out_dtype)

    # Tiny batches can't fill the lane axis; the pure-jnp path is faster.
    if not feature_major and B < min_pallas_batch:
        return _reference_jax(x, state_index_dict).astype(out_dtype)

    assert lane_tile >= 128 and lane_tile % 128 == 0
    lanes = _round_up(_cdiv(B, 8), 128)
    tbl, lanes = _choose_lane_tiling(lanes, lane_tile)
    Bp = 8 * lanes

    # Single fused prep pass: gather only the 10 needed columns (static
    # indices), transpose to feature-major, pad the batch and pack as
    # (10, 8, lanes).  Batch b lives at (sublane b // lanes, lane b % lanes).
    idx = jnp.asarray([int(state_index_dict[n]) for n in _FEATURE_NAMES],
                      dtype=jnp.int32)
    xg = jnp.transpose(x[:, idx])                    # (10, B)
    xg = jnp.pad(xg, ((0, 0), (0, Bp - B)))          # (10, Bp)
    xs = xg.reshape(10, 8, lanes)

    out3 = pl.pallas_call(
        _euc_feature_kernel,
        out_shape=jax.ShapeDtypeStruct((12, 8, lanes), out_dtype),
        grid=(lanes // tbl,),
        in_specs=[pl.BlockSpec((10, 8, tbl), lambda i: (0, 0, i))],
        out_specs=pl.BlockSpec((12, 8, tbl), lambda i: (0, 0, i)),
        compiler_params=pltpu.CompilerParams(
            dimension_semantics=("parallel",)),
    )(xs)

    out_fm = out3.reshape(12, Bp)                    # feature-major, padded
    if feature_major:
        return out_fm
    # PyTorch (B, 12) contract: one unpack transpose pass remains.
    return jnp.transpose(out_fm)[:B]


def _reference_jax(x, state_index_dict):
    """Pure-jnp replica of the PyTorch forward (verification + small-batch path)."""
    g = lambda n: x[:, state_index_dict[n]].astype(jnp.float32)
    alpha, beta, gamma = g("alpha"), g("beta"), g("gamma")
    dalpha, dbeta, dgamma = g("dalpha"), g("dbeta"), g("dgamma")
    phi, theta, dphi, dtheta = g("phi"), g("theta"), g("dphi"), g("dtheta")
    x_quad = jnp.cos(alpha) * jnp.sin(beta) * jnp.cos(gamma) + jnp.sin(alpha) * jnp.sin(gamma)
    y_quad = jnp.sin(alpha) * jnp.sin(beta) * jnp.cos(gamma) - jnp.cos(alpha) * jnp.sin(gamma)
    z_quad = jnp.cos(beta) * jnp.cos(gamma)
    d_x_a = jnp.sin(alpha) * jnp.sin(beta) * jnp.cos(gamma) - jnp.cos(alpha) * jnp.sin(gamma)
    d_x_b = -jnp.cos(alpha) * jnp.cos(beta) * jnp.cos(gamma)
    d_x_g = jnp.cos(alpha) * jnp.sin(beta) * jnp.sin(gamma) - jnp.sin(alpha) * jnp.cos(gamma)
    v_x_quad = dalpha * d_x_a + dbeta * d_x_b + dgamma * d_x_g
    d_y_a = -jnp.cos(alpha) * jnp.sin(beta) * jnp.cos(gamma) - jnp.sin(alpha) * jnp.sin(gamma)
    d_y_b = -jnp.sin(alpha) * jnp.cos(beta) * jnp.cos(gamma)
    d_y_g = jnp.sin(alpha) * jnp.sin(beta) * jnp.sin(gamma) + jnp.cos(alpha) * jnp.cos(gamma)
    v_y_quad = dalpha * d_y_a + dbeta * d_y_b + dgamma * d_y_g
    v_z_quad = dbeta * jnp.sin(beta) * jnp.cos(gamma) + dgamma * jnp.cos(beta) * jnp.sin(gamma)
    x_pend = jnp.sin(theta) * jnp.cos(phi)
    y_pend = -jnp.sin(phi)
    z_pend = jnp.cos(theta) * jnp.cos(phi)
    v_x_pend = -dtheta * jnp.cos(theta) * jnp.cos(phi) + dphi * jnp.sin(theta) * jnp.sin(phi)
    v_y_pend = dphi * jnp.cos(phi)
    v_z_pend = dtheta * jnp.sin(theta) * jnp.cos(phi) + dphi * jnp.cos(theta) * jnp.sin(phi)
    out = jnp.stack([x_quad, y_quad, z_quad, v_x_quad, v_y_quad, v_z_quad,
                     x_pend, y_pend, z_pend, v_x_pend, v_y_pend, v_z_pend], axis=1)
    return out.astype(x.dtype)


if __name__ == "__main__":
    D = 16
    state_index_dict = {
        "alpha": 0, "beta": 1, "gamma": 2,
        "dalpha": 3, "dbeta": 4, "dgamma": 5,
        "phi": 6, "theta": 7, "dphi": 8, "dtheta": 9,
    }

    key = jax.random.PRNGKey(0)
    k_small, k_big = jax.random.split(key)

    # 1) Small batch (B=8): force the Pallas path (min_pallas_batch=0).
    x_small = jax.random.normal(k_small, (8, D), dtype=jnp.float32)
    out_small = jax.block_until_ready(
        transform_euc_nn_input(x_small, state_index_dict, min_pallas_batch=0))
    ref_small = _reference_jax(x_small, state_index_dict)
    assert out_small.shape == (8, 12), out_small.shape
    assert jnp.allclose(out_small, ref_small, atol=1e-5, rtol=1e-5), "small-batch mismatch"

    # 2) Ragged batch, multi-step grid (lane_tile=128 -> 2 grid steps).
    x_big = jax.random.normal(k_big, (1031, D), dtype=jnp.float32)
    out_big = jax.block_until_ready(
        transform_euc_nn_input(x_big, state_index_dict, lane_tile=128,
                               min_pallas_batch=0))
    ref_big = _reference_jax(x_big, state_index_dict)
    assert out_big.shape == (1031, 12), out_big.shape
    assert jnp.allclose(out_big, ref_big, atol=1e-5, rtol=1e-5), "tiled-batch mismatch"

    # 3) Feature-major output path (skips the wrapper unpack pass) with a
    #    multi-column tile (lane_tile=256 -> 2 inner 128-lane columns).
    out_fm = jax.block_until_ready(
        transform_euc_nn_input(x_big, state_index_dict, lane_tile=256,
                               feature_major=True))
    assert out_fm.shape[0] == 12 and out_fm.shape[1] >= 1031, out_fm.shape
    assert jnp.allclose(jnp.transpose(out_fm[:, :1031]), ref_big,
                        atol=1e-5, rtol=1e-5), "feature-major mismatch"

    print("KERNEL_OK")
</pallas_src>

<mosaic_0001>
module attributes {stable_mosaic.version = 11 : i64} {
  func.func @_euc_feature_kernel(%arg0: i32, %arg1: memref<10x8x128xf32, #tpu.memory_space<vmem>>, %arg2: memref<12x8x128xf32, #tpu.memory_space<vmem>>) attributes {dimension_semantics = [#tpu.dimension_semantics<parallel>], iteration_bounds = array<i64: 1>, scalar_prefetch = 0 : i64, scratch_operands = 0 : i64, tpu.core_type = #tpu.core_type<tc>, window_params = [{transform_indices = @transform_0, window_bounds = array<i64: 10, 8, 128>}, {transform_indices = @transform_1, window_bounds = array<i64: 12, 8, 128>}]} {
    %c0 = arith.constant 0 : index
    %c0_0 = arith.constant 0 : index
    %c0_1 = arith.constant 0 : index
    %0 = vector.load %arg1[%c0, %c0_0, %c0_1] : memref<10x8x128xf32, #tpu.memory_space<vmem>>, vector<1x8x128xf32>
    %1 = vector.shape_cast %0 : vector<1x8x128xf32> to vector<8x128xf32>
    %c1 = arith.constant 1 : index
    %c0_2 = arith.constant 0 : index
    %c0_3 = arith.constant 0 : index
    %2 = vector.load %arg1[%c1, %c0_2, %c0_3] : memref<10x8x128xf32, #tpu.memory_space<vmem>>, vector<1x8x128xf32>
    %3 = vector.shape_cast %2 : vector<1x8x128xf32> to vector<8x128xf32>
    %c2 = arith.constant 2 : index
    %c0_4 = arith.constant 0 : index
    %c0_5 = arith.constant 0 : index
    %4 = vector.load %arg1[%c2, %c0_4, %c0_5] : memref<10x8x128xf32, #tpu.memory_space<vmem>>, vector<1x8x128xf32>
    %5 = vector.shape_cast %4 : vector<1x8x128xf32> to vector<8x128xf32>
    %c3 = arith.constant 3 : index
    %c0_6 = arith.constant 0 : index
    %c0_7 = arith.constant 0 : index
    %6 = vector.load %arg1[%c3, %c0_6, %c0_7] : memref<10x8x128xf32, #tpu.memory_space<vmem>>, vector<1x8x128xf32>
    %7 = vector.shape_cast %6 : vector<1x8x128xf32> to vector<8x128xf32>
    %c4 = arith.constant 4 : index
    %c0_8 = arith.constant 0 : index
    %c0_9 = arith.constant 0 : index
    %8 = vector.load %arg1[%c4, %c0_8, %c0_9] : memref<10x8x128xf32, #tpu.memory_space<vmem>>, vector<1x8x128xf32>
    %9 = vector.shape_cast %8 : vector<1x8x128xf32> to vector<8x128xf32>
    %c5 = arith.constant 5 : index
    %c0_10 = arith.constant 0 : index
    %c0_11 = arith.constant 0 : index
    %10 = vector.load %arg1[%c5, %c0_10, %c0_11] : memref<10x8x128xf32, #tpu.memory_space<vmem>>, vector<1x8x128xf32>
    %11 = vector.shape_cast %10 : vector<1x8x128xf32> to vector<8x128xf32>
    %c6 = arith.constant 6 : index
    %c0_12 = arith.constant 0 : index
    %c0_13 = arith.constant 0 : index
    %12 = vector.load %arg1[%c6, %c0_12, %c0_13] : memref<10x8x128xf32, #tpu.memory_space<vmem>>, vector<1x8x128xf32>
    %13 = vector.shape_cast %12 : vector<1x8x128xf32> to vector<8x128xf32>
    %c7 = arith.constant 7 : index
    %c0_14 = arith.constant 0 : index
    %c0_15 = arith.constant 0 : index
    %14 = vector.load %arg1[%c7, %c0_14, %c0_15] : memref<10x8x128xf32, #tpu.memory_space<vmem>>, vector<1x8x128xf32>
    %15 = vector.shape_cast %14 : vector<1x8x128xf32> to vector<8x128xf32>
    %c8 = arith.constant 8 : index
    %c0_16 = arith.constant 0 : index
    %c0_17 = arith.constant 0 : index
    %16 = vector.load %arg1[%c8, %c0_16, %c0_17] : memref<10x8x128xf32, #tpu.memory_space<vmem>>, vector<1x8x128xf32>
    %17 = vector.shape_cast %16 : vector<1x8x128xf32> to vector<8x128xf32>
    %c9 = arith.constant 9 : index
    %c0_18 = arith.constant 0 : index
    %c0_19 = arith.constant 0 : index
    %18 = vector.load %arg1[%c9, %c0_18, %c0_19] : memref<10x8x128xf32, #tpu.memory_space<vmem>>, vector<1x8x128xf32>
    %19 = vector.shape_cast %18 : vector<1x8x128xf32> to vector<8x128xf32>
    %20 = math.cos %1 : vector<8x128xf32>
    %21 = math.sin %1 : vector<8x128xf32>
    %22 = math.cos %3 : vector<8x128xf32>
    %23 = math.sin %3 : vector<8x128xf32>
    %24 = math.cos %5 : vector<8x128xf32>
    %25 = math.sin %5 : vector<8x128xf32>
    %26 = math.cos %13 : vector<8x128xf32>
    %27 = math.sin %13 : vector<8x128xf32>
    %28 = math.cos %15 : vector<8x128xf32>
    %29 = math.sin %15 : vector<8x128xf32>
    %30 = arith.mulf %23, %24 : vector<8x128xf32>
    %31 = arith.mulf %22, %24 : vector<8x128xf32>
    %32 = arith.mulf %23, %25 : vector<8x128xf32>
    %33 = arith.mulf %20, %30 : vector<8x128xf32>
    %34 = arith.mulf %21, %25 : vector<8x128xf32>
    %35 = arith.addf %33, %34 : vector<8x128xf32>
    %36 = arith.mulf %21, %30 : vector<8x128xf32>
    %37 = arith.mulf %20, %25 : vector<8x128xf32>
    %38 = arith.subf %36, %37 : vector<8x128xf32>
    %39 = arith.mulf %7, %38 : vector<8x128xf32>
    %cst = arith.constant 0.000000e+00 : f32
    %40 = vector.broadcast %cst : f32 to vector<8x128xf32>
    %41 = arith.subf %40, %20 : vector<8x128xf32>
    %42 = arith.mulf %41, %31 : vector<8x128xf32>
    %43 = arith.mulf %9, %42 : vector<8x128xf32>
    %44 = arith.addf %39, %43 : vector<8x128xf32>
    %45 = arith.mulf %20, %32 : vector<8x128xf32>
    %46 = arith.mulf %21, %24 : vector<8x128xf32>
    %47 = arith.subf %45, %46 : vector<8x128xf32>
    %48 = arith.mulf %11, %47 : vector<8x128xf32>
    %49 = arith.addf %44, %48 : vector<8x128xf32>
    %cst_20 = arith.constant 0.000000e+00 : f32
    %50 = vector.broadcast %cst_20 : f32 to vector<8x128xf32>
    %51 = arith.subf %50, %7 : vector<8x128xf32>
    %52 = arith.mulf %51, %35 : vector<8x128xf32>
    %cst_21 = arith.constant 0.000000e+00 : f32
    %53 = vector.broadcast %cst_21 : f32 to vector<8x128xf32>
    %54 = arith.subf %53, %21 : vector<8x128xf32>
    %55 = arith.mulf %54, %31 : vector<8x128xf32>
    %56 = arith.mulf %9, %55 : vector<8x128xf32>
    %57 = arith.addf %52, %56 : vector<8x128xf32>
    %58 = arith.mulf %21, %32 : vector<8x128xf32>
    %59 = arith.mulf %20, %24 : vector<8x128xf32>
    %60 = arith.addf %58, %59 : vector<8x128xf32>
    %61 = arith.mulf %11, %60 : vector<8x128xf32>
    %62 = arith.addf %57, %61 : vector<8x128xf32>
    %63 = arith.mulf %9, %30 : vector<8x128xf32>
    %64 = arith.mulf %11, %22 : vector<8x128xf32>
    %65 = arith.mulf %64, %25 : vector<8x128xf32>
    %66 = arith.addf %63, %65 : vector<8x128xf32>
    %67 = arith.mulf %29, %26 : vector<8x128xf32>
    %68 = arith.mulf %28, %26 : vector<8x128xf32>
    %cst_22 = arith.constant 0.000000e+00 : f32
    %69 = vector.broadcast %cst_22 : f32 to vector<8x128xf32>
    %70 = arith.subf %69, %27 : vector<8x128xf32>
    %cst_23 = arith.constant 0.000000e+00 : f32
    %71 = vector.broadcast %cst_23 : f32 to vector<8x128xf32>
    %72 = arith.subf %71, %19 : vector<8x128xf32>
    %73 = arith.mulf %72, %68 : vector<8x128xf32>
    %74 = arith.mulf %17, %29 : vector<8x128xf32>
    %75 = arith.mulf %74, %27 : vector<8x128xf32>
    %76 = arith.addf %73, %75 : vector<8x128xf32>
    %77 = arith.mulf %17, %26 : vector<8x128xf32>
    %78 = arith.mulf %19, %67 : vector<8x128xf32>
    %79 = arith.mulf %17, %28 : vector<8x128xf32>
    %80 = arith.mulf %79, %27 : vector<8x128xf32>
    %81 = arith.addf %78, %80 : vector<8x128xf32>
    %c0_24 = arith.constant 0 : index
    %c0_25 = arith.constant 0 : index
    %c0_26 = arith.constant 0 : index
    %82 = vector.load %arg2[%c0_24, %c0_25, %c0_26] : memref<12x8x128xf32, #tpu.memory_space<vmem>>, vector<1x8x128xf32>
    %83 = vector.shape_cast %82 : vector<1x8x128xf32> to vector<8x128xf32>
    %84 = vector.shape_cast %35 : vector<8x128xf32> to vector<1x8x128xf32>
    tpu.vector_store %arg2[%c0_24, %c0_25, %c0_26], %84 {strides = array<i32>} : memref<12x8x128xf32, #tpu.memory_space<vmem>>, vector<1x8x128xf32>,
    %c1_27 = arith.constant 1 : index
    %c0_28 = arith.constant 0 : index
    %c0_29 = arith.constant 0 : index
    %85 = vector.load %arg2[%c1_27, %c0_28, %c0_29] : memref<12x8x128xf32, #tpu.memory_space<vmem>>, vector<1x8x128xf32>
    %86 = vector.shape_cast %85 : vector<1x8x128xf32> to vector<8x128xf32>
    %87 = vector.shape_cast %38 : vector<8x128xf32> to vector<1x8x128xf32>
    tpu.vector_store %arg2[%c1_27, %c0_28, %c0_29], %87 {strides = array<i32>} : memref<12x8x128xf32, #tpu.memory_space<vmem>>, vector<1x8x128xf32>,
    %c2_30 = arith.constant 2 : index
    %c0_31 = arith.constant 0 : index
    %c0_32 = arith.constant 0 : index
    %88 = vector.load %arg2[%c2_30, %c0_31, %c0_32] : memref<12x8x128xf32, #tpu.memory_space<vmem>>, vector<1x8x128xf32>
    %89 = vector.shape_cast %88 : vector<1x8x128xf32> to vector<8x128xf32>
    %90 = vector.shape_cast %31 : vector<8x128xf32> to vector<1x8x128xf32>
    tpu.vector_store %arg2[%c2_30, %c0_31, %c0_32], %90 {strides = array<i32>} : memref<12x8x128xf32, #tpu.memory_space<vmem>>, vector<1x8x128xf32>,
    %c3_33 = arith.constant 3 : index
    %c0_34 = arith.constant 0 : index
    %c0_35 = arith.constant 0 : index
    %91 = vector.load %arg2[%c3_33, %c0_34, %c0_35] : memref<12x8x128xf32, #tpu.memory_space<vmem>>, vector<1x8x128xf32>
    %92 = vector.shape_cast %91 : vector<1x8x128xf32> to vector<8x128xf32>
    %93 = vector.shape_cast %49 : vector<8x128xf32> to vector<1x8x128xf32>
    tpu.vector_store %arg2[%c3_33, %c0_34, %c0_35], %93 {strides = array<i32>} : memref<12x8x128xf32, #tpu.memory_space<vmem>>, vector<1x8x128xf32>,
    %c4_36 = arith.constant 4 : index
    %c0_37 = arith.constant 0 : index
    %c0_38 = arith.constant 0 : index
    %94 = vector.load %arg2[%c4_36, %c0_37, %c0_38] : memref<12x8x128xf32, #tpu.memory_space<vmem>>, vector<1x8x128xf32>
    %95 = vector.shape_cast %94 : vector<1x8x128xf32> to vector<8x128xf32>
    %96 = vector.shape_cast %62 : vector<8x128xf32> to vector<1x8x128xf32>
    tpu.vector_store %arg2[%c4_36, %c0_37, %c0_38], %96 {strides = array<i32>} : memref<12x8x128xf32, #tpu.memory_space<vmem>>, vector<1x8x128xf32>,
    %c5_39 = arith.constant 5 : index
    %c0_40 = arith.constant 0 : index
    %c0_41 = arith.constant 0 : index
    %97 = vector.load %arg2[%c5_39, %c0_40, %c0_41] : memref<12x8x128xf32, #tpu.memory_space<vmem>>, vector<1x8x128xf32>
    %98 = vector.shape_cast %97 : vector<1x8x128xf32> to vector<8x128xf32>
    %99 = vector.shape_cast %66 : vector<8x128xf32> to vector<1x8x128xf32>
    tpu.vector_store %arg2[%c5_39, %c0_40, %c0_41], %99 {strides = array<i32>} : memref<12x8x128xf32, #tpu.memory_space<vmem>>, vector<1x8x128xf32>,
    %c6_42 = arith.constant 6 : index
    %c0_43 = arith.constant 0 : index
    %c0_44 = arith.constant 0 : index
    %100 = vector.load %arg2[%c6_42, %c0_43, %c0_44] : memref<12x8x128xf32, #tpu.memory_space<vmem>>, vector<1x8x128xf32>
    %101 = vector.shape_cast %100 : vector<1x8x128xf32> to vector<8x128xf32>
    %102 = vector.shape_cast %67 : vector<8x128xf32> to vector<1x8x128xf32>
    tpu.vector_store %arg2[%c6_42, %c0_43, %c0_44], %102 {strides = array<i32>} : memref<12x8x128xf32, #tpu.memory_space<vmem>>, vector<1x8x128xf32>,
    %c7_45 = arith.constant 7 : index
    %c0_46 = arith.constant 0 : index
    %c0_47 = arith.constant 0 : index
    %103 = vector.load %arg2[%c7_45, %c0_46, %c0_47] : memref<12x8x128xf32, #tpu.memory_space<vmem>>, vector<1x8x128xf32>
    %104 = vector.shape_cast %103 : vector<1x8x128xf32> to vector<8x128xf32>
    %105 = vector.shape_cast %70 : vector<8x128xf32> to vector<1x8x128xf32>
    tpu.vector_store %arg2[%c7_45, %c0_46, %c0_47], %105 {strides = array<i32>} : memref<12x8x128xf32, #tpu.memory_space<vmem>>, vector<1x8x128xf32>,
    %c8_48 = arith.constant 8 : index
    %c0_49 = arith.constant 0 : index
    %c0_50 = arith.constant 0 : index
    %106 = vector.load %arg2[%c8_48, %c0_49, %c0_50] : memref<12x8x128xf32, #tpu.memory_space<vmem>>, vector<1x8x128xf32>
    %107 = vector.shape_cast %106 : vector<1x8x128xf32> to vector<8x128xf32>
    %108 = vector.shape_cast %68 : vector<8x128xf32> to vector<1x8x128xf32>
    tpu.vector_store %arg2[%c8_48, %c0_49, %c0_50], %108 {strides = array<i32>} : memref<12x8x128xf32, #tpu.memory_space<vmem>>, vector<1x8x128xf32>,
    %c9_51 = arith.constant 9 : index
    %c0_52 = arith.constant 0 : index
    %c0_53 = arith.constant 0 : index
    %109 = vector.load %arg2[%c9_51, %c0_52, %c0_53] : memref<12x8x128xf32, #tpu.memory_space<vmem>>, vector<1x8x128xf32>
    %110 = vector.shape_cast %109 : vector<1x8x128xf32> to vector<8x128xf32>
    %111 = vector.shape_cast %76 : vector<8x128xf32> to vector<1x8x128xf32>
    tpu.vector_store %arg2[%c9_51, %c0_52, %c0_53], %111 {strides = array<i32>} : memref<12x8x128xf32, #tpu.memory_space<vmem>>, vector<1x8x128xf32>,
    %c10 = arith.constant 10 : index
    %c0_54 = arith.constant 0 : index
    %c0_55 = arith.constant 0 : index
    %112 = vector.load %arg2[%c10, %c0_54, %c0_55] : memref<12x8x128xf32, #tpu.memory_space<vmem>>, vector<1x8x128xf32>
    %113 = vector.shape_cast %112 : vector<1x8x128xf32> to vector<8x128xf32>
    %114 = vector.shape_cast %77 : vector<8x128xf32> to vector<1x8x128xf32>
    tpu.vector_store %arg2[%c10, %c0_54, %c0_55], %114 {strides = array<i32>} : memref<12x8x128xf32, #tpu.memory_space<vmem>>, vector<1x8x128xf32>,
    %c11 = arith.constant 11 : index
    %c0_56 = arith.constant 0 : index
    %c0_57 = arith.constant 0 : index
    %115 = vector.load %arg2[%c11, %c0_56, %c0_57] : memref<12x8x128xf32, #tpu.memory_space<vmem>>, vector<1x8x128xf32>
    %116 = vector.shape_cast %115 : vector<1x8x128xf32> to vector<8x128xf32>
    %117 = vector.shape_cast %81 : vector<8x128xf32> to vector<1x8x128xf32>
    tpu.vector_store %arg2[%c11, %c0_56, %c0_57], %117 {strides = array<i32>} : memref<12x8x128xf32, #tpu.memory_space<vmem>>, vector<1x8x128xf32>,
    return
  }
  func.func @transform_0(%arg0: i32) -> (i32, i32, i32) {
    %c0_i32 = arith.constant 0 : i32
    %c0_i32_0 = arith.constant 0 : i32
    %c0_i32_1 = arith.constant 0 : i32
    return %c0_i32, %c0_i32_0, %arg0 : i32, i32, i32
  }
  func.func @transform_1(%arg0: i32) -> (i32, i32, i32) {
    %c0_i32 = arith.constant 0 : i32
    %c0_i32_0 = arith.constant 0 : i32
    %c0_i32_1 = arith.constant 0 : i32
    return %c0_i32, %c0_i32_0, %arg0 : i32, i32, i32
  }
}

</mosaic_0001>

<bundles_post_ra>
// kernel: tpu_custom_call.1
= control target key start
LH: loop header
LB: loop body
LE: loop exit
PB: predicated region body
PF: predicated region fallthrough
CT: control target
= control target key end

     0   :  { %6 = vsyncpa [#allocation3], 0  ;;  %s2447_s0 = inlined_call_operand.hbm [shape: f32[10,8,128], index: 0, kind: input, shape index: {}]   ;;  %s2448_s1 = inlined_call_operand.hbm [shape: f32[12,8,128], index: 1, kind: output, shape index: {}]  }
   0x1   :  { %7 = vsyncpa [#allocation4], 0  ;;  %s12_s8 = sshll.u32 %s2447_s0, 4  ;;  %s1772_s9 = smov [#allocation2]   ;;  %s13_s8 = int_to_ptr.hbm [resolvable:$true] %s12_s8 }
   0x2   :  { %s14_s10 = sshll.u32 %s1772_s9, 4  ;;  %s1773_s11 = smov 128   ;;  %s15_s10 = int_to_ptr.vmem [resolvable:$true] %s14_s10 }
   0x3   :  { %s1774_s12 = smov 8  }
   0x4   :  { %20 = dma.hbm_to_vmem [thread:$0]  %s13_s8, 1280, %s15_s10, [#allocation3], %s1773_s11, %s1773_s11, %s1774_s12  }
   0x5   :  { %1768 = dma.done.wait [#allocation3], 1280  }
   0x6   :  { %1769 = vsyncadd [#allocation3], 4294966016  ;;  %v1799_v0 = vld [vmem:[#allocation2] sm:$0xff]  ;;  %v1801_v1 = vld [vmem:[#allocation2 + $0x8] sm:$0xff]  ;;  %v1775_v27 = vmov 683565275  }
   0x7   :  { %v1803_v2 = vld [vmem:[#allocation2 + $0x10] sm:$0xff]  ;;  %v44_v3 = vand.u32 2147483647, %v1799_v0  ;;  %v47_v4 = vand.u32 2139095040, %v1799_v0  ;;  %v356_v5 = vand.u32 2139095040, %v1801_v1  ;;  %s1782_s0 = smov [#allocation5]  }
   0x8   :  { %v353_v6 = vand.u32 2147483647, %v1801_v1  ;;  %v665_v10 = vand.u32 2139095040, %v1803_v2  ;;  %v1776_v29 = vmov 2475754826   ;;  %s1663_s13 = sshll.u32 %s1782_s0, 4  ;;  %s1664_s13 = int_to_ptr.vmem [resolvable:$true] %s1663_s13 }
   0x9   :  { %v48_v7 = vshrl.u32 %v47_v4, 23  ;;  %v51_v8 = vand.u32 8388607, %v44_v3  ;;  %v357_v9 = vshrl.u32 %v356_v5, 23  ;;  %v1777_v31 = vmov 2131351028  }
   0xa   :  { %v360_v14 = vand.u32 8388607, %v353_v6  ;;  %v666_v17 = vshrl.u32 %v665_v10, 23  ;;  %v1778_v33 = vmov 2102212464   ;;  %s1665_s16 = sshll.u32 %s2448_s1, 4  ;;  %s1666_s16 = int_to_ptr.hbm [resolvable:$true] %s1665_s16 }
   0xb   :  { %v1678_v11 = vadd.s32 4294967169, %v48_v7  ;;  %v1684_v12 = vadd.s32 4294967169, %v357_v9  ;;  %v52_v13 = vor.u32 8388608, %v51_v8  ;;  %v1779_v35 = vmov 920167782  }
   0xc   :  { %v361_v20 = vor.u32 8388608, %v360_v14  ;;  %v1820_v25 = vadd.s32 4294967169, %v666_v17  ;;  %v1780_v44 = vmov 1326507024  }
   0xd   :  { %v54_v15 = vadd.s32 1, %v1678_v11  ;;  %v363_v16 = vadd.s32 1, %v1684_v12  ;;  %v1814_v19 = vshll.u32 %v52_v13, 8 }
   0xe   :  { %v1828_v38 = vshll.u32 %v361_v20, 8 }
   0xf   :  { %vm55_vm0 = vcmp.gt.s32.totalorder %v54_v15, 0  ;;  %vm364_vm1 = vcmp.gt.s32.totalorder %v363_v16, 0  ;;  %v93_v37 = vand.u32 65535, %v1814_v19  ;;  %v94_v42 = vshrl.u32 %v1814_v19, 16 }
  0x10   :  { %v56_v18 = vsel %vm55_vm0, %v54_v15, 0  ;;  %v365_v21 = vsel %vm364_vm1, %v363_v16, 0 }
  0x11   :  { %v58_v22 = vand.u32 31, %v56_v18  ;;  %v1816_v23 = vshrl.u32 %v56_v18, 5  ;;  %v1818_v24 = vand.u32 31, %v365_v21  ;;  %v1848_v55 = vshrl.u32 %v365_v21, 5 }
  0x13   :  { %v59_v26 = vsub.s32 32, %v58_v22  ;;  %v61_v28 = vshll.u32 %v1775_v27, %v58_v22  ;;  %v64_v30 = vshll.u32 %v1776_v29, %v58_v22  ;;  %v67_v32 = vshll.u32 %v1777_v31, %v58_v22 }
  0x14   :  { %v70_v34 = vshll.u32 %v1778_v33, %v58_v22  ;;  %v73_v36 = vshll.u32 %v1779_v35, %v58_v22  ;;  %vm76_vm2 = vcmp.lt.s32.totalorder %v1816_v23, 1  ;;  %vm79_vm3 = vcmp.lt.s32.totalorder %v1816_v23, 4 }
  0x15   :  { %v62_v39 = vshrl.u32 %v1776_v29, %v59_v26  ;;  %v65_v40 = vshrl.u32 %v1777_v31, %v59_v26  ;;  %v68_v41 = vshrl.u32 %v1778_v33, %v59_v26  ;;  %v71_v43 = vshrl.u32 %v1779_v35, %v59_v26 }
  0x16   :  { %v74_v45 = vshrl.u32 %v1780_v44, %v59_v26  ;;  %v1839_v49 = vsub.s32 32, %v1818_v24  ;;  %v60_v50 = vshrl.u32 %v1775_v27, %v59_v26  ;;  %vm78_vm4 = vcmp.lt.s32.totalorder %v1816_v23, 3 }
  0x17   :  { %v63_v46 = vor.u32 %v62_v39, %v61_v28  ;;  %v66_v47 = vor.u32 %v65_v40, %v64_v30  ;;  %v69_v48 = vor.u32 %v68_v41, %v67_v32  ;;  %v72_v51 = vor.u32 %v71_v43, %v70_v34 }
  0x18   :  { %v75_v52 = vor.u32 %v74_v45, %v73_v36  ;;  %vm77_vm5 = vcmp.lt.s32.totalorder %v1816_v23, 2  ;;  %v370_v58 = vshll.u32 %v1775_v27, %v1818_v24  ;;  %v373_v59 = vshll.u32 %v1776_v29, %v1818_v24 }
  0x19   :  { %v84_v53 = vsel %vm76_vm2, %v63_v46, %v66_v47  ;;  %v88_v54 = vsel %vm76_vm2, %v66_v47, %v69_v48  ;;  %v85_v56 = vsel %vm79_vm3, %v72_v51, 920167782  ;;  %v81_v60 = vsel %vm79_vm3, %v69_v48, 2102212464 }
  0x1a   :  { %v89_v57 = vsel %vm79_vm3, %v75_v52, 1326507024  ;;  %v86_v61 = vsel %vm78_vm4, %v69_v48, %v85_v56  ;;  %v371_v63 = vshrl.u32 %v1776_v29, %v1839_v49  ;;  %v80_v4 = vsel %vm76_vm2, %v60_v50, %v63_v46 }
  0x1b   :  { %v90_v62 = vsel %vm78_vm4, %v72_v51, %v89_v57  ;;  %v87_v5 = vsel %vm77_vm5, %v84_v53, %v86_v61  ;;  %v374_v8 = vshrl.u32 %v1777_v31, %v1839_v49  ;;  %v82_v13 = vsel %vm78_vm4, %v66_v47, %v81_v60 }
  0x1c   :  { %v91_v7 = vsel %vm77_vm5, %v88_v54, %v90_v62  ;;  %v117_v11 = vand.u32 65535, %v87_v5  ;;  %v118_v12 = vshrl.u32 %v87_v5, 16  ;;  %v1876_v14 = vor.u32 %v371_v63, %v370_v58 }
  0x1d   :  { %v95_v9 = vand.u32 65535, %v91_v7  ;;  %v96_v10 = vshrl.u32 %v91_v7, 16  ;;  %v1878_v15 = vor.u32 %v374_v8, %v373_v59  ;;  %v376_v16 = vshll.u32 %v1777_v31, %v1818_v24 }
  0x1e   :  { %v377_v21 = vshrl.u32 %v1778_v33, %v1839_v49  ;;  %v119_v26 = vmul.u32 %v117_v11, %v93_v37  ;;  %v120_v28 = vmul.u32 %v118_v12, %v93_v37  ;;  %v121_v30 = vmul.u32 %v117_v11, %v94_v42 }
  0x1f   :  { %v97_v17 = vmul.u32 %v95_v9, %v93_v37  ;;  %v98_v18 = vmul.u32 %v96_v10, %v93_v37  ;;  %v99_v20 = vmul.u32 %v95_v9, %v94_v42  ;;  %v100_v22 = vmul.u32 %v96_v10, %v94_v42 }
  0x20   :  { %v122_v39 = vmul.u32 %v118_v12, %v94_v42  ;;  %v123_v41 = vshll.u32 %v120_v28, 16  ;;  %v124_v43 = vshrl.u32 %v120_v28, 16  ;;  %v125_v45 = vshll.u32 %v121_v30, 16 }
  0x21   :  { %v101_v32 = vshll.u32 %v98_v18, 16  ;;  %v102_v34 = vshrl.u32 %v98_v18, 16  ;;  %v103_v36 = vshll.u32 %v99_v20, 16  ;;  %v104_v40 = vshrl.u32 %v99_v20, 16 }
  0x22   :  { %v126_v47 = vshrl.u32 %v121_v30, 16  ;;  %v379_v48 = vshll.u32 %v1778_v33, %v1818_v24  ;;  %v1781_v50 = vmov 0   ;;  %vm127_vm7 = vc.u32 %v119_v26, %v123_v41 }
  0x23   :  { %vm105_vm6 = vc.u32 %v97_v17, %v101_v32  ;;  %v107_v46 = vadd.s32 %v101_v32, %v97_v17  ;;  %v129_v37 = vadd.s32 %v123_v41, %v119_v26  ;;  %v380_v52 = vshrl.u32 %v1779_v35, %v1839_v49 }
  0x24   :  { %v106_v51 = vsel %vm105_vm6, 1, %v1781_v50  ;;  %v128_v42 = vsel %vm127_vm7, 1, %v1781_v50  ;;  %v382_v54 = vshll.u32 %v1779_v35, %v1818_v24  ;;  %v378_v58 = vor.u32 %v377_v21, %v376_v16 }
  0x25   :  { %v108_v53 = vadd.s32 %v106_v51, %v100_v22  ;;  %vm109_vm8 = vc.u32 %v107_v46, %v103_v36  ;;  %v130_v57 = vadd.s32 %v128_v42, %v122_v39  ;;  %vm131_vm9 = vc.u32 %v129_v37, %v125_v45 }
  0x26   :  { %v110_v56 = vsel %vm109_vm8, 1, %v1781_v50  ;;  %v132_v60 = vsel %vm131_vm9, 1, %v1781_v50  ;;  %v381_v61 = vor.u32 %v380_v52, %v379_v48  ;;  %v383_v62 = vshrl.u32 %v1780_v44, %v1839_v49 }
  0x27   :  { %v112_v59 = vadd.s32 %v110_v56, %v108_v53  ;;  %v1896_v63 = vadd.s32 %v129_v37, %v125_v45  ;;  %v134_v5 = vadd.s32 %v132_v60, %v130_v57  ;;  %vm385_vm10 = vcmp.lt.s32.totalorder %v1848_v55, 1 }
  0x28   :  { %vm387_vm11 = vcmp.lt.s32.totalorder %v1848_v55, 3  ;;  %v384_v7 = vor.u32 %v383_v62, %v382_v54  ;;  %vm386_vm12 = vcmp.lt.s32.totalorder %v1848_v55, 2  ;;  %vm388_vm13 = vcmp.lt.s32.totalorder %v1848_v55, 4 }
  0x29   :  { %v113_v24 = vadd.s32 %v112_v59, %v102_v34  ;;  %v83_v8 = vsel %vm77_vm5, %v80_v4, %v82_v13  ;;  %v135_v9 = vadd.s32 %v134_v5, %v124_v43  ;;  %v393_v10 = vsel %vm385_vm10, %v1876_v14, %v1878_v15 }
  0x2a   :  { %v394_v11 = vsel %vm388_vm13, %v381_v61, 920167782  ;;  %v397_v17 = vsel %vm385_vm10, %v1878_v15, %v378_v58  ;;  %v402_v23 = vand.u32 65535, %v1828_v38  ;;  %v398_v18 = vsel %vm388_vm13, %v384_v7, 1326507024 }
  0x2b   :  { %v1910_v12 = vadd.s32 %v113_v24, %v104_v40  ;;  %v395_v16 = vsel %vm387_vm11, %v378_v58, %v394_v11  ;;  %v136_v4 = vadd.s32 %v135_v9, %v126_v47  ;;  %v403_v20 = vshrl.u32 %v1828_v38, 16 }
  0x2c   :  { %v396_v13 = vsel %vm386_vm12, %v393_v10, %v395_v16  ;;  %v137_v21 = vmul.u32 %v1814_v19, %v83_v8  ;;  %v399_v22 = vsel %vm387_vm11, %v381_v61, %v398_v18  ;;  %v672_v34 = vadd.s32 1, %v1820_v25 }
  0x2d   :  { %vm139_vm14 = vc.u32 %v1910_v12, %v1896_v63  ;;  %v426_v26 = vand.u32 65535, %v396_v13  ;;  %v140_v28 = vadd.s32 1, %v136_v4  ;;  %v400_v30 = vsel %vm386_vm12, %v397_v17, %v399_v22 }
  0x2e   :  { %v427_v32 = vshrl.u32 %v396_v13, 16  ;;  %v369_v36 = vshrl.u32 %v1775_v27, %v1839_v49  ;;  %v404_v39 = vand.u32 65535, %v400_v30  ;;  %v405_v40 = vshrl.u32 %v400_v30, 16 }
  0x2f   :  { %v141_v19 = vsel %vm139_vm14, %v140_v28, %v136_v4  ;;  %v428_v41 = vmul.u32 %v426_v26, %v402_v23  ;;  %v430_v45 = vmul.u32 %v426_v26, %v403_v20  ;;  %vm673_vm15 = vcmp.gt.s32.totalorder %v672_v34, 0 }
  0x30   :  { %v429_v43 = vmul.u32 %v427_v32, %v402_v23  ;;  %v142_v46 = vadd.s32 %v141_v19, %v137_v21  ;;  %v406_v47 = vmul.u32 %v404_v39, %v402_v23  ;;  %v407_v48 = vmul.u32 %v405_v40, %v402_v23 }
  0x31   :  { %v408_v51 = vmul.u32 %v404_v39, %v403_v20  ;;  %v431_v37 = vmul.u32 %v427_v32, %v403_v20  ;;  %v409_v42 = vmul.u32 %v405_v40, %v403_v20  ;;  %v389_v49 = vsel %vm385_vm10, %v369_v36, %v1876_v14 }
  0x32   :  { %v432_v52 = vshll.u32 %v429_v43, 16  ;;  %v143_v53 = vadd.s32 536870912, %v142_v46  ;;  %v410_v54 = vshll.u32 %v407_v48, 16  ;;  %v390_v56 = vsel %vm388_vm13, %v378_v58, 2102212464 }
  0x33   :  { %v412_v25 = vshll.u32 %v408_v51, 16  ;;  %v434_v57 = vshll.u32 %v430_v45, 16  ;;  %v411_v62 = vshrl.u32 %v407_v48, 16  ;;  %v674_v14 = vsel %vm673_vm15, %v672_v34, 0 }
  0x34   :  { %vm436_vm0 = vc.u32 %v428_v41, %v432_v52  ;;  %v1938_v59 = vshrl.u32 %v143_v53, 30  ;;  %vm414_vm1 = vc.u32 %v406_v47, %v410_v54  ;;  %v416_v60 = vadd.s32 %v410_v54, %v406_v47 }
  0x35   :  { %v437_v61 = vsel %vm436_vm0, 1, %v1781_v50  ;;  %v415_v5 = vsel %vm414_vm1, 1, %v1781_v50  ;;  %v438_v24 = vadd.s32 %v432_v52, %v428_v41  ;;  %v391_v58 = vsel %vm387_vm11, %v1878_v15, %v390_v56 }
  0x36   :  { %v439_v7 = vadd.s32 %v437_v61, %v431_v37  ;;  %v145_v8 = vshll.u32 %v1938_v59, 30  ;;  %v417_v9 = vadd.s32 %v415_v5, %v409_v42  ;;  %vm418_vm2 = vc.u32 %v416_v60, %v412_v25 }
  0x37   :  { %v419_v10 = vsel %vm418_vm2, 1, %v1781_v50  ;;  %v433_v11 = vshrl.u32 %v429_v43, 16  ;;  %vm440_vm3 = vc.u32 %v438_v24, %v434_v57  ;;  %v413_v17 = vshrl.u32 %v408_v51, 16 }
  0x38   :  { %v146_v16 = vsub.s32 %v142_v46, %v145_v8  ;;  %v421_v23 = vadd.s32 %v419_v10, %v417_v9  ;;  %v441_v4 = vsel %vm440_vm3, 1, %v1781_v50  ;;  %v435_v13 = vshrl.u32 %v430_v45, 16 }
  0x39   :  { %v443_v18 = vadd.s32 %v441_v4, %v439_v7  ;;  %v676_v20 = vand.u32 31, %v674_v14  ;;  %v1949_v26 = vadd.s32 %v438_v24, %v434_v57  ;;  %v392_v15 = vsel %vm386_vm12, %v389_v49, %v391_v58 }
  0x3a   :  { %vm147_vm4 = vcmp.lt.s32.totalorder %v146_v16, 0  ;;  %v148_v21 = vsub.s32 0, %v146_v16  ;;  %v422_v22 = vadd.s32 %v421_v23, %v411_v62  ;;  %v446_v40 = vmul.u32 %v1828_v38, %v392_v15 }
  0x3b   :  { %v444_v28 = vadd.s32 %v443_v18, %v433_v11  ;;  %v1955_v39 = vsub.s32 32, %v676_v20  ;;  %v138_v19 = vadd.s32 %v1896_v63, %v1910_v12  ;;  %v662_v55 = vand.u32 2147483647, %v1803_v2 }
  0x3c   :  { %v149_v30 = vsel %vm147_vm4, %v148_v21, %v146_v16  ;;  %v1953_v32 = vadd.s32 %v422_v22, %v413_v17  ;;  %v679_v45 = vshll.u32 %v1775_v27, %v676_v20  ;;  %v682_v46 = vshll.u32 %v1776_v29, %v676_v20 }
  0x3d   :  { %v150_v34 = vclz %v149_v30  ;;  %v445_v36 = vadd.s32 %v444_v28, %v435_v13  ;;  %v685_v47 = vshll.u32 %v1777_v31, %v676_v20  ;;  %v688_v48 = vshll.u32 %v1778_v33, %v676_v20 }
  0x3e   :  { %vm448_vm5 = vc.u32 %v1953_v32, %v1949_v26  ;;  %v680_v51 = vshrl.u32 %v1776_v29, %v1955_v39  ;;  %v683_v63 = vshrl.u32 %v1777_v31, %v1955_v39  ;;  %v686_v52 = vshrl.u32 %v1778_v33, %v1955_v39 }
  0x3f   :  { %v1679_v41 = vadd.s32 4294967294, %v150_v34  ;;  %v449_v43 = vadd.s32 1, %v445_v36  ;;  %v689_v53 = vshrl.u32 %v1779_v35, %v1955_v39  ;;  %v1975_v49 = vshrl.u32 %v674_v14, 5 }
  0x40   :  { %v168_v56 = vsub.s32 4, %v1938_v59  ;;  %v669_v57 = vand.u32 8388607, %v662_v55  ;;  %v691_v60 = vshll.u32 %v1779_v35, %v676_v20  ;;  %v1981_v24 = vor.u32 %v680_v51, %v679_v45 }
  0x41   :  { %vm1680_vm6 = vcmp.lt.s32.totalorder %v1679_v41, 0  ;;  %v450_v38 = vsel %vm448_vm5, %v449_v43, %v445_v36  ;;  %v1983_v7 = vor.u32 %v683_v63, %v682_v46  ;;  %v1985_v8 = vor.u32 %v686_v52, %v685_v47 }
  0x42   :  { %v153_v12 = vsel %vm1680_vm6, 0, %v1679_v41  ;;  %v451_v37 = vadd.s32 %v450_v38, %v446_v40  ;;  %v690_v9 = vor.u32 %v689_v53, %v688_v48  ;;  %v692_v14 = vshrl.u32 %v1780_v44, %v1955_v39 }
  0x43   :  { %v154_v42 = vsub.s32 32, %v153_v12  ;;  %v155_v54 = vshll.u32 %v146_v16, %v153_v12  ;;  %v158_v25 = vsub.s32 4294967266, %v153_v12  ;;  %vm697_vm7 = vcmp.lt.s32.totalorder %v1975_v49, 4 }
  0x44   :  { %v452_v5 = vadd.s32 536870912, %v451_v37  ;;  %vm46_vm8 = vcmp.lt.s32.totalorder %v1799_v0, 0  ;;  %v670_v16 = vor.u32 8388608, %v669_v57  ;;  %v693_v17 = vor.u32 %v692_v14, %v691_v60 }
  0x45   :  { %v156_v61 = vshrl.u32 %v138_v19, %v154_v42  ;;  %v159_v62 = vadd.s32 127, %v158_v25  ;;  %vm694_vm9 = vcmp.lt.s32.totalorder %v1975_v49, 1  ;;  %vm696_vm10 = vcmp.lt.s32.totalorder %v1975_v49, 3 }
  0x46   :  { %v1989_v11 = vshrl.u32 %v452_v5, 30  ;;  %v169_v18 = vsel %vm46_vm8, %v168_v56, %v1938_v59  ;;  %vm695_vm11 = vcmp.lt.s32.totalorder %v1975_v49, 2  ;;  %v703_v20 = vsel %vm697_vm7, %v690_v9, 920167782 }
  0x47   :  { %v157_v58 = vor.u32 %v156_v61, %v155_v54  ;;  %v160_v10 = vshll.u32 %v159_v62, 23  ;;  %v707_v21 = vsel %vm697_vm7, %v693_v17, 1326507024  ;;  %v702_v28 = vsel %vm694_vm9, %v1981_v24, %v1983_v7 }
  0x48   :  { %v454_v13 = vshll.u32 %v1989_v11, 30  ;;  %v706_v59 = vsel %vm694_vm9, %v1983_v7, %v1985_v8  ;;  %vm2014_vm12 = vcmp.le.f32.partialorder %v44_v3, 0.7853982  ;;  %v704_v34 = vsel %vm696_vm10, %v1985_v8, %v703_v20 }
  0x49   :  { %v161_v23 = vor.u32 4788187, %v160_v10  ;;  %v164_v4 = vcvt.s32.f32 %v157_v58  ;;  %v708_v36 = vsel %vm696_vm10, %v690_v9, %v707_v21  ;;  %v2023_v40 = vshll.u32 %v670_v16, 8 }
  0x4a   :  { %v455_v15 = vsub.s32 %v451_v37, %v454_v13  ;;  %v171_v41 = vsel %vm2014_vm12, 0, %v169_v18  ;;  %v705_v3 = vsel %vm695_vm11, %v702_v28, %v704_v34  ;;  %v709_v45 = vsel %vm695_vm11, %v706_v59, %v708_v36 }
  0x4b   :  { %v162_v22 = vand.u32 2147483647, %v161_v23  ;;  %v711_v46 = vand.u32 65535, %v2023_v40  ;;  %v712_v47 = vshrl.u32 %v2023_v40, 16  ;;  %v713_v51 = vand.u32 65535, %v709_v45 }
  0x4c   :  { %vm456_vm13 = vcmp.lt.s32.totalorder %v455_v15, 0  ;;  %v457_v43 = vsub.s32 0, %v455_v15  ;;  %v714_v63 = vshrl.u32 %v709_v45, 16  ;;  %v342_v12 = vadd.s32 3, %v171_v41 }
  0x4d   :  { %v165_v19 = vmul.f32 %v164_v4, %v162_v22  ;;  %v678_v53 = vshrl.u32 %v1775_v27, %v1955_v39  ;;  %v736_v54 = vshrl.u32 %v705_v3, 16  ;;  %v447_v56 = vadd.s32 %v1949_v26, %v1953_v32 }
  0x4e   :  { %v458_v38 = vsel %vm456_vm13, %v457_v43, %v455_v15  ;;  %v716_v42 = vmul.u32 %v714_v63, %v711_v46  ;;  %v715_v60 = vmul.u32 %v713_v51, %v711_v46  ;;  %v2046_v62 = vmul.u32 %v713_v51, %v712_v47 }
  0x4f   :  { %v166_v48 = vxor.u32 2147483648, %v165_v19  ;;  %v459_v37 = vclz %v458_v38  ;;  %v735_v9 = vand.u32 65535, %v705_v3  ;;  %v2048_v39 = vand.u32 3, %v171_v41 }
  0x50   :  { %v719_v5 = vshll.u32 %v716_v42, 16  ;;  %v2050_v14 = vand.u32 3, %v342_v12  ;;  %v718_v58 = vmul.u32 %v714_v63, %v712_v47  ;;  %v2052_v23 = vmul.u32 %v736_v54, %v711_v46 }
  0x51   :  { %v167_v52 = vsel %vm46_vm8, %v166_v48, %v165_v19  ;;  %v1685_v57 = vadd.s32 4294967294, %v459_v37  ;;  %v721_v20 = vshll.u32 %v2046_v62, 16  ;;  %v737_v21 = vmul.u32 %v735_v9, %v711_v46 }
  0x52   :  { %v2040_v25 = vsel %vm2014_vm12, %v1799_v0, %v167_v52  ;;  %vm723_vm15 = vc.u32 %v715_v60, %v719_v5  ;;  %v739_v30 = vmul.u32 %v735_v9, %v712_v47  ;;  %vm355_vm0 = vcmp.lt.s32.totalorder %v1801_v1, 0 }
  0x53   :  { %v172_v61 = vmul.f32 %v2040_v25, %v2040_v25  ;;  %vm1686_vm14 = vcmp.lt.s32.totalorder %v1685_v57, 0  ;;  %v724_v59 = vsel %vm723_vm15, 1, %v1781_v50  ;;  %v725_v19 = vadd.s32 %v719_v5, %v715_v60 }
  0x54   :  { %v462_v17 = vsel %vm1686_vm14, 0, %v1685_v57  ;;  %v726_v41 = vadd.s32 %v724_v59, %v718_v58  ;;  %vm2059_vm1 = vcmp.le.f32.partialorder %v353_v6, 0.7853982  ;;  %v720_v45 = vshrl.u32 %v716_v42, 16 }
  0x55   :  { %v173_v10 = vmul.f32 -0.001358992, %v172_v61  ;;  %v180_v16 = vmul.f32 -0.00019511016, %v172_v61  ;;  %v463_v26 = vsub.s32 32, %v462_v17  ;;  %v464_v32 = vshll.u32 %v455_v15, %v462_v17 }
  0x56   :  { %v467_v4 = vsub.s32 4294967266, %v462_v17  ;;  %v741_v46 = vshll.u32 %v2052_v23, 16  ;;  %vm727_vm2 = vc.u32 %v725_v19, %v721_v20  ;;  %v740_v51 = vmul.u32 %v736_v54, %v712_v47 }
  0x57   :  { %v174_v13 = vadd.f32 0.041655596, %v173_v10  ;;  %v181_v18 = vadd.f32 0.008332121, %v180_v16  ;;  %v465_v22 = vshrl.u32 %v447_v56, %v463_v26  ;;  %v728_v37 = vsel %vm727_vm2, 1, %v1781_v50  ;;  %v2073_v16 = vld [vmem:[#allocation2 + $0x30] sm:$0xff] }
  0x58   :  { %v468_v28 = vadd.s32 127, %v467_v4  ;;  %v743_v52 = vshll.u32 %v739_v30, 16  ;;  %v698_v6 = vsel %vm694_vm9, %v678_v53, %v1981_v24  ;;  %v699_v42 = vsel %vm697_vm7, %v1985_v8, 2102212464 }
  0x59   :  { %v175_v34 = vmul.f32 %v174_v13, %v172_v61  ;;  %v182_v36 = vmul.f32 %v181_v18, %v172_v61  ;;  %v466_v43 = vor.u32 %v465_v22, %v464_v32  ;;  %v730_v57 = vadd.s32 %v728_v37, %v726_v41 }
  0x5a   :  { %v469_v3 = vshll.u32 %v468_v28, 23  ;;  %vm745_vm3 = vc.u32 %v737_v21, %v741_v46  ;;  %v747_v9 = vadd.s32 %v741_v46, %v737_v21  ;;  %v722_v54 = vshrl.u32 %v2046_v62, 16 }
  0x5b   :  { %v176_v48 = vadd.f32 -0.4999988, %v175_v34  ;;  %v183_v38 = vadd.f32 -0.16666654, %v182_v36  ;;  %v473_v12 = vcvt.s32.f32 %v466_v43  ;;  %v731_v58 = vadd.s32 %v730_v57, %v720_v45 }
  0x5c   :  { %v470_v63 = vor.u32 4788187, %v469_v3  ;;  %v746_v10 = vsel %vm745_vm3, 1, %v1781_v50  ;;  %v742_v24 = vshrl.u32 %v2052_v23, 16  ;;  %vm749_vm4 = vc.u32 %v747_v9, %v743_v52 }
  0x5d   :  { %v184_v56 = vmul.f32 %v183_v38, %v172_v61  ;;  %v177_v60 = vmul.f32 %v176_v48, %v172_v61  ;;  %v748_v53 = vadd.s32 %v746_v10, %v740_v51  ;;  %v477_v8 = vsub.s32 4, %v1989_v11 }
  0x5e   :  { %v471_v5 = vand.u32 2147483647, %v470_v63  ;;  %v700_v61 = vsel %vm696_vm10, %v1983_v7, %v699_v42  ;;  %v744_v26 = vshrl.u32 %v739_v30, 16  ;;  %v750_v32 = vsel %vm749_vm4, 1, %v1781_v50 }
  0x5f   :  { %v185_v47 = vadd.f32 1.0, %v184_v56  ;;  %v178_v62 = vadd.f32 1.0, %v177_v60  ;;  %v752_v13 = vadd.s32 %v750_v32, %v748_v53  ;;  %v974_v18 = vand.u32 2139095040, %v2073_v16  ;;  %v2123_v53 = vld [vmem:[#allocation2 + $0x38] sm:$0xff] }
  0x60   :  { %v474_v17 = vmul.f32 %v473_v12, %v471_v5  ;;  %v732_v21 = vadd.s32 %v731_v58, %v722_v54  ;;  %v751_v23 = vadd.s32 %v747_v9, %v743_v52  ;;  %vm189_vm5 = vcmp.lt.s32.totalorder %v2048_v39, 2 }
  0x61   :  { %v186_v20 = vmul.f32 %v185_v47, %v2040_v25  ;;  %v701_v7 = vsel %vm695_vm11, %v698_v6, %v700_v61  ;;  %v753_v28 = vadd.s32 %v752_v13, %v742_v24  ;;  %v975_v59 = vshrl.u32 %v974_v18, 23 }
  0x62   :  { %v475_v4 = vxor.u32 2147483648, %v474_v17  ;;  %vm190_vm6 = vcmp.eq.s32.totalorder %v2048_v39, 0  ;;  %vm193_vm7 = vcmp.eq.s32.totalorder %v2048_v39, 2  ;;  %vm345_vm8 = vcmp.eq.s32.totalorder %v2050_v14, 0 }
  0x63   :  { %v194_v30 = vxor.u32 2147483648, %v178_v62  ;;  %v478_v34 = vsel %vm355_vm0, %v477_v8, %v1989_v11  ;;  %v754_v36 = vadd.s32 %v753_v28, %v744_v26  ;;  %v191_v19 = vxor.u32 2147483648, %v186_v20 }
  0x64   :  { %v476_v22 = vsel %vm355_vm0, %v475_v4, %v474_v17  ;;  %v755_v41 = vmul.u32 %v2023_v40, %v701_v7  ;;  %vm757_vm9 = vc.u32 %v732_v21, %v751_v23  ;;  %v1696_v43 = vadd.s32 4294967169, %v975_v59 }
  0x65   :  { %v2094_v25 = vsel %vm2059_vm1, %v1801_v1, %v476_v22  ;;  %vm348_vm10 = vcmp.eq.s32.totalorder %v2050_v14, 2  ;;  %v758_v46 = vadd.s32 1, %v754_v36  ;;  %vm344_vm11 = vcmp.lt.s32.totalorder %v2050_v14, 2 }
  0x66   :  { %v481_v49 = vmul.f32 %v2094_v25, %v2094_v25  ;;  %v2106_v48 = vsel %vm2059_vm1, 0, %v478_v34  ;;  %v971_v11 = vand.u32 2147483647, %v2073_v16  ;;  %v981_v38 = vadd.s32 1, %v1696_v43 }
  0x67   :  { %v195_v51 = vsel %vm193_vm7, %v194_v30, %v186_v20  ;;  %v759_v12 = vsel %vm757_vm9, %v758_v46, %v754_v36  ;;  %v192_v37 = vsel %vm190_vm6, %v178_v62, %v191_v19  ;;  %v350_v52 = vsel %vm348_vm10, %v194_v30, %v186_v20 }
  0x68   :  { %v482_v3 = vmul.f32 -0.001358992, %v481_v49  ;;  %v489_v45 = vmul.f32 -0.00019511016, %v481_v49  ;;  %v760_v56 = vadd.s32 %v759_v12, %v755_v41  ;;  %vm982_vm12 = vcmp.gt.s32.totalorder %v981_v38, 0 }
  0x69   :  { %v347_v15 = vsel %vm345_vm8, %v178_v62, %v191_v19  ;;  %v983_v57 = vsel %vm982_vm12, %v981_v38, 0  ;;  %v651_v60 = vadd.s32 3, %v2106_v48  ;;  %vm187_vm13 = vweird.f32 %v1799_v0 }
  0x6a   :  { %v483_v40 = vadd.f32 0.041655596, %v482_v3  ;;  %v490_v63 = vadd.f32 0.008332121, %v489_v45  ;;  %v761_v5 = vadd.s32 536870912, %v760_v56  ;;  %v985_v9 = vand.u32 31, %v983_v57 }
  0x6b   :  { %v978_v54 = vand.u32 8388607, %v971_v11  ;;  %v196_v58 = vsel %vm189_vm5, %v192_v37, %v195_v51  ;;  %v351_v10 = vsel %vm344_vm11, %v347_v15, %v350_v52  ;;  %v2127_v26 = vand.u32 3, %v651_v60 }
  0x6c   :  { %v484_v6 = vmul.f32 %v483_v40, %v481_v49  ;;  %v491_v42 = vmul.f32 %v490_v63, %v481_v49  ;;  %v762_v24 = vshrl.u32 %v761_v5, 30  ;;  %v2125_v61 = vsub.s32 32, %v985_v9 }
  0x6d   :  { %v2129_v0 = vadd.s32 %v751_v23, %v732_v21  ;;  %v2131_v62 = vsel %vm187_vm13, nan, %v196_v58  ;;  %v2133_v4 = vsel %vm187_vm13, nan, %v351_v10  ;;  %vm664_vm14 = vcmp.lt.s32.totalorder %v1803_v2, 0 }
  0x6e   :  { %v492_v47 = vadd.f32 -0.16666654, %v491_v42  ;;  %v485_v17 = vadd.f32 -0.4999988, %v484_v6  ;;  %v763_v32 = vshll.u32 %v762_v24, 30  ;;  %v979_v39 = vor.u32 8388608, %v978_v54 }
  0x6f   :  { %v1283_v14 = vand.u32 2139095040, %v2123_v53  ;;  %v2139_v20 = vshrl.u32 %v983_v57, 5  ;;  %v991_v22 = vshll.u32 %v1776_v29, %v985_v9  ;;  %v992_v21 = vshrl.u32 %v1777_v31, %v2125_v61 }
  0x70   :  { %v493_v8 = vmul.f32 %v492_v47, %v481_v49  ;;  %v486_v13 = vmul.f32 %v485_v17, %v481_v49  ;;  %v2137_v18 = vsub.s32 %v760_v56, %v763_v32  ;;  %v994_v23 = vshll.u32 %v1777_v31, %v985_v9 }
  0x71   :  { %v997_v28 = vshll.u32 %v1778_v33, %v985_v9  ;;  %v995_v30 = vshrl.u32 %v1778_v33, %v2125_v61  ;;  %v998_v34 = vshrl.u32 %v1779_v35, %v2125_v61  ;;  %vm654_vm0 = vcmp.eq.s32.totalorder %v2127_v26, 0 }
  0x72   :  { %v494_v7 = vadd.f32 1.0, %v493_v8  ;;  %vm765_vm15 = vcmp.lt.s32.totalorder %v2137_v18, 0  ;;  %v766_v59 = vsub.s32 0, %v2137_v18  ;;  %vm657_vm1 = vcmp.eq.s32.totalorder %v2127_v26, 2 }
  0x73   :  { %vm2156_vm2 = vcmp.le.f32.partialorder %v662_v55, 0.7853982  ;;  %v988_v36 = vshll.u32 %v1775_v27, %v985_v9  ;;  %v1000_v19 = vshll.u32 %v1779_v35, %v985_v9  ;;  %v1001_v41 = vshrl.u32 %v1780_v44, %v2125_v61 }
  0x74   :  { %v2164_v43 = vshll.u32 %v979_v39, 8  ;;  %v2166_v3 = vadd.f32 1.0, %v486_v13  ;;  %v767_v45 = vsel %vm765_vm15, %v766_v59, %v2137_v18  ;;  %v786_v46 = vsub.s32 4, %v762_v24 }
  0x75   :  { %v989_v55 = vshrl.u32 %v1776_v29, %v2125_v61  ;;  %v2172_v38 = vmul.f32 %v494_v7, %v2094_v25  ;;  %v768_v51 = vclz %v767_v45  ;;  %v1002_v40 = vor.u32 %v1001_v41, %v1000_v19 }
  0x76   :  { %vm1006_vm3 = vcmp.lt.s32.totalorder %v2139_v20, 4  ;;  %vm653_vm4 = vcmp.lt.s32.totalorder %v2127_v26, 2  ;;  %v993_v63 = vor.u32 %v992_v21, %v991_v22  ;;  %v996_v12 = vor.u32 %v995_v30, %v994_v23 }
  0x77   :  { %v999_v37 = vor.u32 %v998_v34, %v997_v28  ;;  %v1280_v52 = vand.u32 2147483647, %v2123_v53  ;;  %v1691_v56 = vadd.s32 4294967294, %v768_v51  ;;  %vm1003_vm5 = vcmp.lt.s32.totalorder %v2139_v20, 1 }
  0x78   :  { %vm1005_vm6 = vcmp.lt.s32.totalorder %v2139_v20, 3  ;;  %v1284_v15 = vshrl.u32 %v1283_v14, 23  ;;  %v787_v25 = vsel %vm664_vm14, %v786_v46, %v762_v24  ;;  %v990_v6 = vor.u32 %v989_v55, %v988_v36 }
  0x79   :  { %v1016_v42 = vsel %vm1006_vm3, %v1002_v40, 1326507024  ;;  %v1020_v57 = vand.u32 65535, %v2164_v43  ;;  %v500_v60 = vxor.u32 2147483648, %v2172_v38  ;;  %v503_v5 = vxor.u32 2147483648, %v2166_v3 }
  0x7a   :  { %vm1692_vm7 = vcmp.lt.s32.totalorder %v1691_v56, 0  ;;  %vm1004_vm8 = vcmp.lt.s32.totalorder %v2139_v20, 2  ;;  %v1012_v47 = vsel %vm1006_vm3, %v999_v37, 920167782  ;;  %v1015_v54 = vsel %vm1003_vm5, %v993_v63, %v996_v12 }
  0x7b   :  { %v771_v9 = vsel %vm1692_vm7, 0, %v1691_v56  ;;  %v1017_v58 = vsel %vm1005_vm6, %v999_v37, %v1016_v42  ;;  %v1702_v8 = vadd.s32 4294967169, %v1284_v15  ;;  %v789_v32 = vsel %vm2156_vm2, 0, %v787_v25 }
  0x7c   :  { %v772_v10 = vsub.s32 32, %v771_v9  ;;  %v773_v17 = vshll.u32 %v2137_v18, %v771_v9  ;;  %v776_v24 = vsub.s32 4294967266, %v771_v9  ;;  %v1011_v39 = vsel %vm1003_vm5, %v990_v6, %v993_v63 }
  0x7d   :  { %v1021_v14 = vshrl.u32 %v2164_v43, 16  ;;  %v2201_v13 = vand.u32 8388607, %v1280_v52  ;;  %v1013_v18 = vsel %vm1005_vm6, %v996_v12, %v1012_v47  ;;  %v1018_v21 = vsel %vm1004_vm8, %v1015_v54, %v1017_v58 }
  0x7e   :  { %v774_v22 = vshrl.u32 %v2129_v0, %v772_v10  ;;  %v777_v7 = vadd.s32 127, %v776_v24  ;;  %v656_v23 = vsel %vm654_vm0, %v2166_v3, %v500_v60  ;;  %v659_v28 = vsel %vm657_vm1, %v503_v5, %v2172_v38 }
  0x7f   :  { %v2215_v59 = vand.u32 3, %v2106_v48  ;;  %v987_v0 = vshrl.u32 %v1775_v27, %v2125_v61  ;;  %v1008_v36 = vsel %vm1006_vm3, %v996_v12, 2102212464  ;;  %v1290_v19 = vadd.s32 1, %v1702_v8 }
  0x80   :  { %v775_v30 = vor.u32 %v774_v22, %v773_v17  ;;  %v778_v34 = vshll.u32 %v777_v7, 23  ;;  %v960_v41 = vadd.s32 3, %v789_v32  ;;  %v1014_v45 = vsel %vm1004_vm8, %v1011_v39, %v1013_v18 }
  0x81   :  { %v1022_v46 = vand.u32 65535, %v1018_v21  ;;  %v1023_v55 = vshrl.u32 %v1018_v21, 16  ;;  %v660_v51 = vsel %vm653_vm4, %v656_v23, %v659_v28  ;;  %v1044_v37 = vand.u32 65535, %v1014_v45 }
  0x82   :  { %v779_v48 = vor.u32 4788187, %v778_v34  ;;  %v782_v40 = vcvt.s32.f32 %v775_v30  ;;  %v2225_v56 = vand.u32 3, %v789_v32  ;;  %vm499_vm9 = vcmp.eq.s32.totalorder %v2215_v59, 0  ;;  %v2244_v34 = vld [vmem:[#allocation2 + $0x10] sm:$0xff] }
  0x83   :  { %v1007_v61 = vsel %vm1003_vm5, %v987_v0, %v990_v6  ;;  %v1009_v12 = vsel %vm1005_vm6, %v993_v63, %v1008_v36  ;;  %v1024_v25 = vmul.u32 %v1022_v46, %v1020_v57  ;;  %v1025_v42 = vmul.u32 %v1023_v55, %v1020_v57 }
  0x84   :  { %v780_v15 = vand.u32 2147483647, %v779_v48  ;;  %v1026_v9 = vmul.u32 %v1022_v46, %v1021_v14  ;;  %v2232_v47 = vand.u32 3, %v960_v41  ;;  %vm502_vm10 = vcmp.eq.s32.totalorder %v2215_v59, 2 }
  0x85   :  { %v1045_v26 = vshrl.u32 %v1014_v45, 16  ;;  %v1048_v54 = vmul.u32 %v1044_v37, %v1021_v14  ;;  %vm496_vm11 = vweird.f32 %v1801_v1  ;;  %v1027_v10 = vmul.u32 %v1023_v55, %v1021_v14 }
  0x86   :  { %v783_v58 = vmul.f32 %v782_v40, %v780_v15  ;;  %v1028_v17 = vshll.u32 %v1025_v42, 16  ;;  %v1030_v24 = vshll.u32 %v1026_v9, 16  ;;  %vm498_vm12 = vcmp.lt.s32.totalorder %v2215_v59, 2 }
  0x87   :  { %v501_v63 = vsel %vm499_vm9, %v2166_v3, %v500_v60  ;;  %v1046_v6 = vmul.u32 %v1044_v37, %v1020_v57  ;;  %v1047_v8 = vmul.u32 %v1045_v26, %v1020_v57  ;;  %v504_v39 = vsel %vm502_vm10, %v503_v5, %v2172_v38 }
  0x88   :  { %v784_v32 = vxor.u32 2147483648, %v783_v58  ;;  %vm1032_vm13 = vc.u32 %v1024_v25, %v1028_v17  ;;  %v1034_v22 = vadd.s32 %v1028_v17, %v1024_v25  ;;  %v1049_v18 = vmul.u32 %v1045_v26, %v1021_v14 }
  0x89   :  { %v1033_v7 = vsel %vm1032_vm13, 1, %v1781_v50  ;;  %v1050_v21 = vshll.u32 %v1047_v8, 16  ;;  %v1052_v23 = vshll.u32 %v1048_v54, 16  ;;  %v1029_v0 = vshrl.u32 %v1025_v42, 16 }
  0x8a   :  { %v785_v28 = vsel %vm664_vm14, %v784_v32, %v783_v58  ;;  %v1035_v30 = vadd.s32 %v1033_v7, %v1027_v10  ;;  %vm1036_vm15 = vc.u32 %v1034_v22, %v1030_v24  ;;  %v1031_v5 = vshrl.u32 %v1026_v9, 16 }
  0x8b   :  { %v2249_v3 = vsel %vm2156_vm2, %v2244_v34, %v785_v28  ;;  %v1037_v38 = vsel %vm1036_vm15, 1, %v1781_v50  ;;  %vm1054_vm0 = vc.u32 %v1046_v6, %v1050_v21  ;;  %v1056_v57 = vadd.s32 %v1050_v21, %v1046_v6 }
  0x8c   :  { %v790_v60 = vmul.f32 %v2249_v3, %v2249_v3  ;;  %v1039_v2 = vadd.s32 %v1037_v38, %v1035_v30  ;;  %v1055_v14 = vsel %vm1054_vm0, 1, %v1781_v50  ;;  %v1051_v36 = vshrl.u32 %v1047_v8, 16  ;;  %v2284_v8 = vld [vmem:[#allocation2 + $0x18] sm:$0xff] }
  0x8d   :  { %v1057_v41 = vadd.s32 %v1055_v14, %v1049_v18  ;;  %vm1058_vm14 = vc.u32 %v1056_v57, %v1052_v23  ;;  %vm1291_vm1 = vcmp.gt.s32.totalorder %v1290_v19, 0  ;;  %v505_v48 = vsel %vm498_vm12, %v501_v63, %v504_v39 }
  0x8e   :  { %v791_v45 = vmul.f32 -0.001358992, %v790_v60  ;;  %v798_v46 = vmul.f32 -0.00019511016, %v790_v60  ;;  %v1040_v49 = vadd.s32 %v1039_v2, %v1029_v0  ;;  %v1059_v55 = vsel %vm1058_vm14, 1, %v1781_v50 }
  0x8f   :  { %v1053_v40 = vshrl.u32 %v1048_v54, 16  ;;  %v1061_v37 = vadd.s32 %v1059_v55, %v1057_v41  ;;  %v1292_v15 = vsel %vm1291_vm1, %v1290_v19, 0  ;;  %v2260_v26 = vadd.s32 %v1056_v57, %v1052_v23 }
  0x90   :  { %v792_v25 = vadd.f32 0.041655596, %v791_v45  ;;  %v799_v42 = vadd.f32 0.008332121, %v798_v46  ;;  %v2258_v9 = vadd.s32 %v1040_v49, %v1031_v5  ;;  %v2264_v58 = vsel %vm496_vm11, nan, %v660_v51  ;;  %v35_v46 = vld [vmem:[#allocation2 + $0x28] sm:$0xff] }
  0x91   :  { %v1010_v10 = vsel %vm1004_vm8, %v1007_v61, %v1009_v12  ;;  %v1062_v17 = vadd.s32 %v1061_v37, %v1051_v36  ;;  %v1294_v24 = vand.u32 31, %v1292_v15  ;;  %vm811_vm2 = vcmp.eq.s32.totalorder %v2225_v56, 2 }
  0x92   :  { %v793_v59 = vmul.f32 %v792_v25, %v790_v60  ;;  %v800_v63 = vmul.f32 %v799_v42, %v790_v60  ;;  %vm966_vm3 = vcmp.eq.s32.totalorder %v2232_v47, 2  ;;  %vm808_vm4 = vcmp.eq.s32.totalorder %v2225_v56, 0 }
  0x93   :  { %vm963_vm5 = vcmp.eq.s32.totalorder %v2232_v47, 0  ;;  %v2274_v19 = vsel %vm496_vm11, nan, %v505_v48  ;;  %v1599_v51 = vsub.f32 0.0, %v2131_v62  ;;  %v1063_v20 = vadd.s32 %v1062_v17, %v1053_v40 }
  0x94   :  { %v2277_v61 = vsub.s32 32, %v1294_v24  ;;  %v794_v12 = vadd.f32 -0.4999988, %v793_v59  ;;  %v801_v54 = vadd.f32 -0.16666654, %v800_v63  ;;  %vm807_vm6 = vcmp.lt.s32.totalorder %v2225_v56, 2 }
  0x95   :  { %vm962_vm7 = vcmp.lt.s32.totalorder %v2232_v47, 2  ;;  %v1064_v6 = vmul.u32 %v2164_v43, %v1010_v10  ;;  %vm1066_vm8 = vc.u32 %v2258_v9, %v2260_v26  ;;  %vm805_vm9 = vweird.f32 %v2244_v34 }
  0x96   :  { %v1610_v1 = vsub.f32 0.0, %v2133_v4  ;;  %v1067_v32 = vadd.s32 1, %v1063_v20  ;;  %v1297_v39 = vshll.u32 %v1775_v27, %v1294_v24  ;;  %v1298_v22 = vshrl.u32 %v1776_v29, %v2277_v61 }
  0x97   :  { %v795_v7 = vmul.f32 %v794_v12, %v790_v60  ;;  %v802_v18 = vmul.f32 %v801_v54, %v790_v60  ;;  %v1300_v21 = vshll.u32 %v1776_v29, %v1294_v24  ;;  %v1301_v43 = vshrl.u32 %v1777_v31, %v2277_v61 }
  0x98   :  { %v1068_v23 = vsel %vm1066_vm8, %v1067_v32, %v1063_v20  ;;  %v2294_v28 = vshrl.u32 %v1292_v15, 5  ;;  %v1306_v0 = vshll.u32 %v1778_v33, %v1294_v24  ;;  %v1307_v30 = vshrl.u32 %v1779_v35, %v2277_v61 }
  0x99   :  { %v796_v38 = vadd.f32 1.0, %v795_v7  ;;  %v803_v57 = vadd.f32 1.0, %v802_v18  ;;  %v1608_v5 = vsub.f32 0.0, %v2284_v8  ;;  %v1069_v2 = vadd.s32 %v1068_v23, %v1064_v6 }
  0x9a   :  { %v1288_v60 = vor.u32 8388608, %v2201_v13  ;;  %v2301_v14 = vor.u32 %v1298_v22, %v1297_v39  ;;  %v1303_v29 = vshll.u32 %v1777_v31, %v1294_v24  ;;  %v1304_v36 = vshrl.u32 %v1778_v33, %v2277_v61  ;;  %v33_v22 = vld [vmem:[#allocation2 + $0x20] sm:$0xff] }
  0x9b   :  { %v804_v41 = vmul.f32 %v803_v57, %v2249_v3  ;;  %v812_v45 = vxor.u32 2147483648, %v796_v38  ;;  %v1070_v49 = vadd.s32 536870912, %v1069_v2  ;;  %v2307_v55 = vor.u32 %v1301_v43, %v1300_v21 }
  0x9c   :  { %v2309_v48 = vor.u32 %v1307_v30, %v1306_v0  ;;  %v2312_v40 = vshll.u32 %v1779_v35, %v1294_v24  ;;  %v2316_v13 = vshrl.u32 %v1780_v44, %v2277_v61  ;;  %vm1312_vm10 = vcmp.lt.s32.totalorder %v2294_v28, 1 }
  0x9d   :  { %v809_v31 = vxor.u32 2147483648, %v804_v41  ;;  %v813_v33 = vsel %vm811_vm2, %v812_v45, %v804_v41  ;;  %v968_v3 = vsel %vm966_vm3, %v812_v45, %v804_v41  ;;  %v2323_v37 = vshrl.u32 %v1070_v49, 30 }
  0x9e   :  { %v1620_v15 = vmul.f32 %v2274_v19, %v35_v46  ;;  %v2326_v25 = vor.u32 %v1304_v36, %v1303_v29  ;;  %vm1315_vm11 = vcmp.lt.s32.totalorder %v2294_v28, 4  ;;  %v2329_v35 = vshll.u32 %v1288_v60, 8 }
  0x9f   :  { %v810_v44 = vsel %vm808_vm4, %v796_v38, %v809_v31  ;;  %v965_v42 = vsel %vm963_vm5, %v796_v38, %v809_v31  ;;  %v1072_v10 = vshll.u32 %v2323_v37, 30  ;;  %vm1313_vm12 = vcmp.lt.s32.totalorder %v2294_v28, 2 }
  0xa0   :  { %vm1314_vm13 = vcmp.lt.s32.totalorder %v2294_v28, 3  ;;  %v814_v17 = vsel %vm807_vm6, %v810_v44, %v813_v33  ;;  %v969_v24 = vsel %vm962_vm7, %v965_v42, %v968_v3  ;;  %v1311_v59 = vor.u32 %v2316_v13, %v2312_v40 }
  0xa1   :  { %v1320_v63 = vsel %vm1312_vm10, %v2301_v14, %v2307_v55  ;;  %v815_v20 = vsel %vm805_vm9, nan, %v814_v17  ;;  %v970_v12 = vsel %vm805_vm9, nan, %v969_v24  ;;  %v2352_v54 = vsub.s32 %v1069_v2, %v1072_v10 }
  0xa2   :  { %v1321_v56 = vsel %vm1315_vm11, %v2309_v48, 920167782  ;;  %v1589_v47 = vmul.f32 %v815_v20, %v2264_v58  ;;  %v1593_v6 = vmul.f32 %v970_v12, %v2133_v4  ;;  %v1596_v32 = vmul.f32 %v970_v12, %v2131_v62 }
  0xa3   :  { %v1590_v39 = vmul.f32 %v815_v20, %v2274_v19  ;;  %v1591_v7 = vmul.f32 %v970_v12, %v2264_v58  ;;  %v1604_v34 = vmul.f32 %v815_v20, %v2133_v4  ;;  %v1615_v18 = vmul.f32 %v815_v20, %v2131_v62 }
  0xa4   :  { %v1621_v21 = vmul.f32 %v1620_v15, %v970_v12  ;;  %v1592_v43 = vmul.f32 %v1589_v47, %v2131_v62  ;;  %v1595_v23 = vmul.f32 %v1589_v47, %v2133_v4  ;;  %v1619_v38 = vmul.f32 %v1589_v47, %v33_v22 }
  0xa5   :  { %1640 = vst [vmem:[#allocation5 + $0x10] sm:$0xff] %v1590_v39  ;;  %v1600_v0 = vmul.f32 %v1599_v51, %v1590_v39  ;;  %v1611_v30 = vmul.f32 %v1610_v1, %v1590_v39  ;;  %v1603_v19 = vmul.f32 %v1591_v7, %v2131_v62  ;;  %v1614_v58 = vmul.f32 %v1591_v7, %v2133_v4 }
  0xa6   :  { %vm1074_vm15 = vcmp.lt.s32.totalorder %v2352_v54, 0  ;;  %v1594_v57 = vadd.f32 %v1593_v6, %v1592_v43  ;;  %v1597_v2 = vsub.f32 %v1595_v23, %v1596_v32  ;;  %v1622_v45 = vadd.f32 %v1621_v21, %v1619_v38 }
  0xa7   :  { %v1601_v60 = vmul.f32 %v1600_v0, %v33_v22  ;;  %v1612_v29 = vmul.f32 %v1611_v30, %v33_v22  ;;  %v1605_v36 = vsub.f32 %v1603_v19, %v1604_v34  ;;  %v1616_v41 = vadd.f32 %v1615_v18, %v1614_v58 }
  0xa8   :  { %v1075_v49 = vsub.s32 0, %v2352_v54  ;;  %v1609_v51 = vmul.f32 %v1608_v5, %v1594_v57  ;;  %1636 = vst [vmem:[#allocation5] sm:$0xff] %v1594_v57  ;;  %v1598_v1 = vmul.f32 %v1597_v2, %v2284_v8  ;;  %v1324_v62 = vsel %vm1312_vm10, %v2307_v55, %v2326_v25 }
  0xa9   :  { %v1329_v4 = vand.u32 65535, %v2329_v35  ;;  %1638 = vst [vmem:[#allocation5 + $0x8] sm:$0xff] %v1597_v2  ;;  %v1606_v40 = vmul.f32 %v1605_v36, %v35_v46  ;;  %v1617_v13 = vmul.f32 %v1616_v41, %v35_v46  ;;  %v1322_v5 = vsel %vm1314_vm13, %v2326_v25, %v1321_v56 }
  0xaa   :  { %v1076_v31 = vsel %vm1074_vm15, %v1075_v49, %v2352_v54  ;;  %v1602_v33 = vadd.f32 %v1601_v60, %v1598_v1  ;;  %v1613_v8 = vadd.f32 %v1612_v29, %v1609_v51  ;;  %1646 = vst [vmem:[#allocation5 + $0x28] sm:$0xff] %v1622_v45  ;;  %v1323_v15 = vsel %vm1313_vm12, %v1320_v63, %v1322_v5 }
  0xab   :  { %v1077_v3 = vclz %v1076_v31  ;;  %v1325_v44 = vsel %vm1315_vm11, %v1311_v59, 1326507024  ;;  %v1353_v42 = vand.u32 65535, %v1323_v15  ;;  %v1354_v46 = vshrl.u32 %v1323_v15, 16 }
  0xac   :  { %v1607_v10 = vadd.f32 %v1606_v40, %v1602_v33  ;;  %v1618_v17 = vadd.f32 %v1617_v13, %v1613_v8  ;;  %v1326_v20 = vsel %vm1314_vm13, %v2309_v48, %v1325_v44  ;;  %v1330_v56 = vshrl.u32 %v2329_v35, 16 }
  0xad   :  { %v1697_v24 = vadd.s32 4294967294, %v1077_v3  ;;  %v1327_v12 = vsel %vm1313_vm12, %v1324_v62, %v1326_v20  ;;  %v1356_v47 = vmul.u32 %v1354_v46, %v1329_v4  ;;  %v1065_v63 = vadd.s32 %v2260_v26, %v2258_v9 }
  0xae   :  { %1642 = vst [vmem:[#allocation5 + $0x18] sm:$0xff] %v1607_v10  ;;  %v1331_v59 = vand.u32 65535, %v1327_v12  ;;  %v1332_v32 = vshrl.u32 %v1327_v12, 16  ;;  %v1355_v48 = vmul.u32 %v1353_v42, %v1329_v4  ;;  %v1357_v21 = vmul.u32 %v1353_v42, %v1330_v56  ;;  %v41_v42 = vld [vmem:[#allocation2 + $0x40] sm:$0xff] }
  0xaf   :  { %vm1698_vm0 = vcmp.lt.s32.totalorder %v1697_v24, 0  ;;  %1644 = vst [vmem:[#allocation5 + $0x20] sm:$0xff] %v1618_v17  ;;  %v1359_v43 = vshll.u32 %v1356_v47, 16  ;;  %v1296_v30 = vshrl.u32 %v1775_v27, %v2277_v61  ;;  %v1317_v26 = vsel %vm1315_vm11, %v2326_v25, 2102212464 }
  0xb0   :  { %v1080_v6 = vsel %vm1698_vm0, 0, %v1697_v24  ;;  %v1333_v34 = vmul.u32 %v1331_v59, %v1329_v4  ;;  %v1334_v18 = vmul.u32 %v1332_v32, %v1329_v4  ;;  %v1335_v9 = vmul.u32 %v1331_v59, %v1330_v56 }
  0xb1   :  { %v1081_v39 = vsub.s32 32, %v1080_v6  ;;  %v1082_v22 = vshll.u32 %v2352_v54, %v1080_v6  ;;  %v1085_v7 = vsub.s32 4294967266, %v1080_v6  ;;  %v1336_v19 = vmul.u32 %v1332_v32, %v1330_v56 }
  0xb2   :  { %v1337_v58 = vshll.u32 %v1334_v18, 16  ;;  %v1358_v38 = vmul.u32 %v1354_v46, %v1330_v56  ;;  %v1338_v2 = vshrl.u32 %v1334_v18, 16  ;;  %v1339_v60 = vshll.u32 %v1335_v9, 16 }
  0xb3   :  { %v1083_v23 = vshrl.u32 %v1065_v63, %v1081_v39  ;;  %v1086_v0 = vadd.s32 127, %v1085_v7  ;;  %v1361_v36 = vshll.u32 %v1357_v21, 16  ;;  %vm1363_vm1 = vc.u32 %v1355_v48, %v1359_v43 }
  0xb4   :  { %vm1341_vm14 = vc.u32 %v1333_v34, %v1337_v58  ;;  %v1343_v29 = vadd.s32 %v1337_v58, %v1333_v34  ;;  %v1364_v61 = vsel %vm1363_vm1, 1, %v1781_v50  ;;  %v1365_v25 = vadd.s32 %v1359_v43, %v1355_v48 }
  0xb5   :  { %v1084_v54 = vor.u32 %v1083_v23, %v1082_v22  ;;  %v1087_v57 = vshll.u32 %v1086_v0, 23  ;;  %v1342_v27 = vsel %vm1341_vm14, 1, %v1781_v50  ;;  %v1366_v51 = vadd.s32 %v1364_v61, %v1358_v38 }
  0xb6   :  { %v1344_v49 = vadd.s32 %v1342_v27, %v1336_v19  ;;  %vm1345_vm2 = vc.u32 %v1343_v29, %v1339_v60  ;;  %v1340_v4 = vshrl.u32 %v1335_v9, 16  ;;  %v1360_v13 = vshrl.u32 %v1356_v47, 16 }
  0xb7   :  { %v1088_v41 = vor.u32 4788187, %v1087_v57  ;;  %v1091_v45 = vcvt.s32.f32 %v1084_v54  ;;  %v1346_v62 = vsel %vm1345_vm2, 1, %v1781_v50  ;;  %vm1367_vm3 = vc.u32 %v1365_v25, %v1361_v36 }
  0xb8   :  { %v1348_v40 = vadd.s32 %v1346_v62, %v1344_v49  ;;  %v1316_v5 = vsel %vm1312_vm10, %v1296_v30, %v2301_v14  ;;  %v1318_v33 = vsel %vm1314_vm13, %v2307_v55, %v1317_v26  ;;  %v1368_v8 = vsel %vm1367_vm3, 1, %v1781_v50 }
  0xb9   :  { %v1089_v1 = vand.u32 2147483647, %v1088_v41  ;;  %vm973_vm4 = vcmp.lt.s32.totalorder %v2073_v16, 0  ;;  %v1362_v15 = vshrl.u32 %v1357_v21, 16  ;;  %v1370_v44 = vadd.s32 %v1368_v8, %v1366_v51 }
  0xba   :  { %v1349_v3 = vadd.s32 %v1348_v40, %v1338_v2  ;;  %vm2417_vm5 = vcmp.le.f32.partialorder %v971_v11, 0.7853982  ;;  %v1369_v10 = vadd.s32 %v1365_v25, %v1361_v36  ;;  %v1319_v14 = vsel %vm1313_vm12, %v1316_v5, %v1318_v33 }
  0xbb   :  { %v1092_v31 = vmul.f32 %v1091_v45, %v1089_v1  ;;  %v1371_v55 = vadd.s32 %v1370_v44, %v1360_v13  ;;  %v1373_v11 = vmul.u32 %v2329_v35, %v1319_v14  ;;  %v1095_v48 = vsub.s32 4, %v2323_v37 }
  0xbc   :  { %v1350_v17 = vadd.s32 %v1349_v3, %v1340_v4  ;;  %vm1114_vm0 = vweird.f32 %v2073_v16  ;;  %vm1282_vm14 = vcmp.lt.s32.totalorder %v2123_v53, 0  ;;  %vm1281_vm1 = vcmp.le.f32.partialorder %v1280_v52, 0.7853982 }
  0xbd   :  { %v1093_v46 = vxor.u32 2147483648, %v1092_v31  ;;  %v1372_v20 = vadd.s32 %v1371_v55, %v1362_v15  ;;  %v1096_v35 = vsel %vm973_vm4, %v1095_v48, %v2323_v37 }
  0xbe   :  { %vm1375_vm6 = vc.u32 %v1350_v17, %v1369_v10  ;;  %v1098_v19 = vsel %vm2417_vm5, 0, %v1096_v35  ;;  %v1374_v41 = vadd.s32 %v1369_v10, %v1350_v17 }
  0xbf   :  { %v1094_v50 = vsel %vm973_vm4, %v1093_v46, %v1092_v31  ;;  %v1376_v56 = vadd.s32 1, %v1372_v20  ;;  %v1115_v2 = vand.u32 3, %v1098_v19  ;;  %v1269_v45 = vadd.s32 3, %v1098_v19 }
  0xc0   :  { %v1097_v24 = vsel %vm2417_vm5, %v2073_v16, %v1094_v50 }
  0xc1   :  { %v1099_v12 = vmul.f32 %v1097_v24, %v1097_v24  ;;  %v1377_v59 = vsel %vm1375_vm6, %v1376_v56, %v1372_v20  ;;  %vm1117_vm9 = vcmp.eq.s32.totalorder %v1115_v2, 0  ;;  %vm1120_vm10 = vcmp.eq.s32.totalorder %v1115_v2, 2 }
  0xc2   :  { %v1378_v32 = vadd.s32 %v1377_v59, %v1373_v11  ;;  %vm1116_vm11 = vcmp.lt.s32.totalorder %v1115_v2, 2  ;;  %v1270_v25 = vand.u32 3, %v1269_v45 }
  0xc3   :  { %v1100_v47 = vmul.f32 -0.001358992, %v1099_v12  ;;  %v1107_v63 = vmul.f32 -0.00019511016, %v1099_v12 }
  0xc4   :  { %v1379_v7 = vadd.s32 536870912, %v1378_v32  ;;  %vm1272_vm12 = vcmp.eq.s32.totalorder %v1270_v25, 0  ;;  %vm1275_vm13 = vcmp.eq.s32.totalorder %v1270_v25, 2  ;;  %vm1271_vm15 = vcmp.lt.s32.totalorder %v1270_v25, 2 }
  0xc5   :  { %v1101_v28 = vadd.f32 0.041655596, %v1100_v47  ;;  %v1108_v6 = vadd.f32 0.008332121, %v1107_v63 }
  0xc6   :  { %v1380_v18 = vshrl.u32 %v1379_v7, 30 }
  0xc7   :  { %v1102_v39 = vmul.f32 %v1101_v28, %v1099_v12  ;;  %v1109_v22 = vmul.f32 %v1108_v6, %v1099_v12 }
  0xc8   :  { %v1381_v23 = vshll.u32 %v1380_v18, 30  ;;  %v1404_v50 = vsub.s32 4, %v1380_v18 }
  0xc9   :  { %v1110_v34 = vadd.f32 -0.16666654, %v1109_v22  ;;  %v1103_v21 = vadd.f32 -0.4999988, %v1102_v39 }
  0xca   :  { %v1382_v0 = vsub.s32 %v1378_v32, %v1381_v23  ;;  %v1405_v20 = vsel %vm1282_vm14, %v1404_v50, %v1380_v18 }
  0xcb   :  { %v1111_v43 = vmul.f32 %v1110_v34, %v1099_v12  ;;  %v1104_v30 = vmul.f32 %v1103_v21, %v1099_v12  ;;  %v1407_v56 = vsel %vm1281_vm1, 0, %v1405_v20 }
  0xcc   :  { %vm1383_vm7 = vcmp.lt.s32.totalorder %v1382_v0, 0  ;;  %v1384_v26 = vsub.s32 0, %v1382_v0  ;;  %v1578_v6 = vadd.s32 3, %v1407_v56  ;;  %v1424_v34 = vand.u32 3, %v1407_v56 }
  0xcd   :  { %v1112_v9 = vadd.f32 1.0, %v1111_v43  ;;  %v1105_v38 = vadd.f32 1.0, %v1104_v30 }
  0xce   :  { %v1385_v58 = vsel %vm1383_vm7, %v1384_v26, %v1382_v0  ;;  %v1579_v48 = vand.u32 3, %v1578_v6  ;;  %vm1429_vm3 = vcmp.eq.s32.totalorder %v1424_v34, 2  ;;  %vm1426_vm6 = vcmp.eq.s32.totalorder %v1424_v34, 0  ;;  %v43_v26 = vld [vmem:[#allocation2 + $0x48] sm:$0xff] }
  0xcf   :  { %v1113_v54 = vmul.f32 %v1112_v9, %v1097_v24  ;;  %v1386_v57 = vclz %v1385_v58  ;;  %v1121_v36 = vxor.u32 2147483648, %v1105_v38  ;;  %vm1425_vm7 = vcmp.lt.s32.totalorder %v1424_v34, 2 }
  0xd0   :  { %vm1584_vm2 = vcmp.eq.s32.totalorder %v1579_v48, 2  ;;  %vm1580_vm4 = vcmp.lt.s32.totalorder %v1579_v48, 2  ;;  %vm1581_vm5 = vcmp.eq.s32.totalorder %v1579_v48, 0 }
  0xd1   :  { %v1703_v60 = vadd.s32 4294967294, %v1386_v57  ;;  %v1118_v29 = vxor.u32 2147483648, %v1113_v54  ;;  %v1122_v1 = vsel %vm1120_vm10, %v1121_v36, %v1113_v54  ;;  %v1277_v33 = vsel %vm1275_vm13, %v1121_v36, %v1113_v54 }
  0xd2   :  { %v1626_v57 = vsub.f32 0.0, %v43_v26 }
  0xd3   :  { %vm1704_vm8 = vcmp.lt.s32.totalorder %v1703_v60, 0  ;;  %v1119_v51 = vsel %vm1117_vm9, %v1105_v38, %v1118_v29  ;;  %v1274_v31 = vsel %vm1272_vm12, %v1105_v38, %v1118_v29 }
  0xd4   :  { %v1389_v37 = vsel %vm1704_vm8, 0, %v1703_v60  ;;  %v1123_v5 = vsel %vm1116_vm11, %v1119_v51, %v1122_v1  ;;  %v1278_v15 = vsel %vm1271_vm15, %v1274_v31, %v1277_v33  ;;  %vm1423_vm8 = vweird.f32 %v2123_v53 }
  0xd5   :  { %v1390_v27 = vsub.s32 32, %v1389_v37  ;;  %v1391_v61 = vshll.u32 %v1382_v0, %v1389_v37  ;;  %v1394_v49 = vsub.s32 4294967266, %v1389_v37  ;;  %v1279_v44 = vsel %vm1114_vm0, nan, %v1278_v15 }
  0xd6   :  { %v1124_v46 = vsel %vm1114_vm0, nan, %v1123_v5  ;;  %v1625_v14 = vsub.f32 0.0, %v1279_v44 }
  0xd7   :  { %v1392_v62 = vshrl.u32 %v1374_v41, %v1390_v27  ;;  %v1395_v4 = vadd.s32 127, %v1394_v49  ;;  %v1631_v17 = vmul.f32 %v1124_v46, %v41_v42 }
  0xd8   :  { %1650 = vst [vmem:[#allocation5 + $0x38] sm:$0xff] %v1625_v14 }
  0xd9   :  { %v1393_v40 = vor.u32 %v1392_v62, %v1391_v61  ;;  %v1396_v13 = vshll.u32 %v1395_v4, 23  ;;  %1656 = vst [vmem:[#allocation5 + $0x50] sm:$0xff] %v1631_v17 }
  0xdb   :  { %v1397_v8 = vor.u32 4788187, %v1396_v13  ;;  %v1400_v3 = vcvt.s32.f32 %v1393_v40 }
  0xdd   :  { %v1398_v10 = vand.u32 2147483647, %v1397_v8 }
  0xdf   :  { %v1401_v55 = vmul.f32 %v1400_v3, %v1398_v10 }
  0xe1   :  { %v1402_v16 = vxor.u32 2147483648, %v1401_v55 }
  0xe3   :  { %v1403_v24 = vsel %vm1282_vm14, %v1402_v16, %v1401_v55 }
  0xe4   :  { %v1406_v12 = vsel %vm1281_vm1, %v2123_v53, %v1403_v24 }
  0xe5   :  { %v1408_v11 = vmul.f32 %v1406_v12, %v1406_v12 }
  0xe7   :  { %v1409_v47 = vmul.f32 -0.001358992, %v1408_v11  ;;  %v1416_v63 = vmul.f32 -0.00019511016, %v1408_v11 }
  0xe9   :  { %v1410_v59 = vadd.f32 0.041655596, %v1409_v47  ;;  %v1417_v28 = vadd.f32 0.008332121, %v1416_v63 }
  0xeb   :  { %v1411_v32 = vmul.f32 %v1410_v59, %v1408_v11  ;;  %v1418_v39 = vmul.f32 %v1417_v28, %v1408_v11 }
  0xed   :  { %v1412_v22 = vadd.f32 -0.4999988, %v1411_v32  ;;  %v1419_v7 = vadd.f32 -0.16666654, %v1418_v39 }
  0xef   :  { %v1413_v21 = vmul.f32 %v1412_v22, %v1408_v11  ;;  %v1420_v52 = vmul.f32 %v1419_v7, %v1408_v11 }
  0xf1   :  { %v1414_v43 = vadd.f32 1.0, %v1413_v21  ;;  %v1421_v23 = vadd.f32 1.0, %v1420_v52 }
  0xf3   :  { %v1422_v18 = vmul.f32 %v1421_v23, %v1406_v12  ;;  %v1430_v35 = vxor.u32 2147483648, %v1414_v43 }
  0xf5   :  { %v1427_v0 = vxor.u32 2147483648, %v1422_v18  ;;  %v1586_v30 = vsel %vm1584_vm2, %v1430_v35, %v1422_v18  ;;  %v1431_v9 = vsel %vm1429_vm3, %v1430_v35, %v1422_v18 }
  0xf7   :  { %v1583_v19 = vsel %vm1581_vm5, %v1414_v43, %v1427_v0  ;;  %v1428_v58 = vsel %vm1426_vm6, %v1414_v43, %v1427_v0 }
  0xf8   :  { %v1587_v38 = vsel %vm1580_vm4, %v1583_v19, %v1586_v30  ;;  %v1432_v54 = vsel %vm1425_vm7, %v1428_v58, %v1431_v9 }
  0xf9   :  { %v1588_v2 = vsel %vm1423_vm8, nan, %v1587_v38  ;;  %v1433_v60 = vsel %vm1423_vm8, nan, %v1432_v54 }
  0xfa   :  { %v1623_v29 = vmul.f32 %v1588_v2, %v1124_v46  ;;  %v1628_v36 = vmul.f32 %v1588_v2, %v41_v42  ;;  %v1624_v41 = vmul.f32 %v1433_v60, %v1124_v46  ;;  %v1633_v37 = vmul.f32 %v1433_v60, %v41_v42 }
  0xfc   :  { %1648 = vst [vmem:[#allocation5 + $0x30] sm:$0xff] %v1623_v29  ;;  %v1627_v45 = vmul.f32 %v1626_v57, %v1624_v41  ;;  %v1629_v27 = vmul.f32 %v1628_v36, %v1279_v44  ;;  %v1632_v61 = vmul.f32 %v1623_v29, %v43_v26  ;;  %v1634_v49 = vmul.f32 %v1633_v37, %v1279_v44 }
  0xfd   :  { %1652 = vst [vmem:[#allocation5 + $0x40] sm:$0xff] %v1624_v41 }
  0xfe   :  { %v1630_v53 = vadd.f32 %v1629_v27, %v1627_v45  ;;  %v1635_v25 = vadd.f32 %v1634_v49, %v1632_v61 }
 0x100   :  { %1654 = vst [vmem:[#allocation5 + $0x48] sm:$0xff] %v1630_v53 }
 0x101   :  { %1658 = vst [vmem:[#allocation5 + $0x58] sm:$0xff] %v1635_v25 }
 0x102   :  { %1671 = dma.vmem_to_hbm [thread:$0]  %s1664_s13, 1536, %s1666_s16, [#allocation4], %s1773_s11, %s1773_s11, %s1774_s12  }
 0x103   :  { %1770 = dma.done.wait [#allocation4], 1536  }
 0x104   :  { %1771 = vsyncadd [#allocation4], 4294965760 }
 0x105   :  { %1676 = vsyncpa [#allocation3], 1 }
 0x106   :  { %1677 = vsyncpa [#allocation4], 1 }

</bundles_post_ra>
